<compile_context>
chip_gen: v7x
topology: tpu7x:2x2x1
jax: 0.10.0
libtpu: 0.0.40
codegen_flags: <defaults>
</compile_context>

<pallas_src>
import math

import jax
import jax.numpy as jnp
from jax.experimental import pallas as pl
from jax.experimental.pallas import tpu as pltpu

# ---- KANLinear hyper-parameters (module defaults) ---------------------------
KERNEL_SIZE = (2, 2)
IN_FEATURES = KERNEL_SIZE[0] * KERNEL_SIZE[1]        # 4
OUT_FEATURES = 1
GRID_SIZE = 5
SPLINE_ORDER = 3
GRID_RANGE = (-1.0, 1.0)
NUM_BASES = GRID_SIZE + SPLINE_ORDER                 # 8

# Extended knot vector (non-trainable buffer; identical per feature, baked as
# compile-time constants).  Uniform spacing.
_H = (GRID_RANGE[1] - GRID_RANGE[0]) / GRID_SIZE
KNOTS = [GRID_RANGE[0] + (i - SPLINE_ORDER) * _H
         for i in range(GRID_SIZE + 2 * SPLINE_ORDER + 1)]   # 12 knots
N_KNOTS = len(KNOTS)

# Normalization factor for the unnormalized Cox-de Boor recursion:
#   B^k_t = C^k_t / (k! h^k).  Folded into the spline weights in the wrapper.
INV_NORM = 1.0 / (math.factorial(SPLINE_ORDER) * (_H ** SPLINE_ORDER))

# ---- tiling constants -------------------------------------------------------
LANES = 128
CHUNK_ROWS = 8           # 8x128 f32 = one vreg per live intermediate
MAX_BLOCK_ROWS = 1024    # up to 1024x128 lanes (2 MiB of patch data) per step


# ---- Pallas kernel ----------------------------------------------------------
def kan_conv_kernel(patch_ref, bw_ref, sw_ref, out_ref):
    """patch_ref: (4, TR, 128) VMEM; bw_ref: (4,) SMEM;
    sw_ref: (4, 8) SMEM (already scaled by INV_NORM); out_ref: (TR, 128) VMEM.
    """
    tr = out_ref.shape[0]
    n_chunks = tr // CHUNK_ROWS

    # Hoist all scalar weight reads out of the chunk loop (SMEM -> sregs once).
    bw = [bw_ref[f] for f in range(IN_FEATURES)]
    sw = [[sw_ref[f, g] for g in range(NUM_BASES)] for f in range(IN_FEATURES)]

    @pl.loop(0, n_chunks)
    def _(c):
        r0 = pl.multiple_of(c * CHUNK_ROWS, CHUNK_ROWS)

        parts = []                      # one independent partial per feature
        for f in range(IN_FEATURES):
            xf = patch_ref[f, pl.ds(r0, CHUNK_ROWS), :]           # (8, 128)

            # Base (linear) term: base_w[f] * SiLU(x_f)  (sigmoid -> EUP).
            base = bw[f] * (xf * jax.nn.sigmoid(xf))

            # Unnormalized, division-free Cox-de Boor recursion.
            #   C^0_t = [K[t] <= x < K[t+1]]
            #   C^k_t = (x - K[t]) * C^{k-1}_t - (x - K[t+k+1]) * C^{k-1}_{t+1}
            # 1/(3! h^3) is folded into sw (host-side), so no per-level scaling.
            d = [xf - KNOTS[t] for t in range(N_KNOTS)]            # 12 subs
            step = [(xf >= KNOTS[t]).astype(jnp.float32)
                    for t in range(N_KNOTS)]                       # 12 cmps
            bases = [step[t] - step[t + 1] for t in range(N_KNOTS - 1)]
            for k in range(1, SPLINE_ORDER + 1):
                bases = [
                    d[t] * bases[t] - d[t + k + 1] * bases[t + 1]
                    for t in range(len(bases) - 1)
                ]                                                  # -> 8 bases

            # Spline term: 8 scalar MACs as two independent 4-term trees
            # (short dependency chains, no cross-sublane reduce).
            s_lo = ((sw[f][0] * bases[0] + sw[f][1] * bases[1])
                    + (sw[f][2] * bases[2] + sw[f][3] * bases[3]))
            s_hi = ((sw[f][4] * bases[4] + sw[f][5] * bases[5])
                    + (sw[f][6] * bases[6] + sw[f][7] * bases[7]))
            parts.append(base + (s_lo + s_hi))

        # Tree-add the four independent per-feature partials.
        out_ref[pl.ds(r0, CHUNK_ROWS), :] = (
            (parts[0] + parts[1]) + (parts[2] + parts[3]))


# ---- Wrapper: patch extraction (glue) + pallas_call -------------------------
def _round_up(a, b):
    return ((a + b - 1) // b) * b


@jax.jit
def kan_convolution_forward(x, base_weight, scaled_spline_weight):
    """x: (B, C, H, W) f32 -> (B, C, H-1, W-1) f32.

    base_weight:          (4,)    == KANLinear.base_weight[0]
    scaled_spline_weight: (4, 8)  == (spline_weight * spline_scaler[..., None])[0]
    """
    B, C, H, W = x.shape
    kh, kw = KERNEL_SIZE
    Ho, Wo = H - kh + 1, W - kw + 1
    n = B * C * Ho * Wo

    # TODO(synk): fuse the 2x2 unfold into the kernel (halo'd HxW slab per
    # channel) to drop this wrapper-side stack+pad HBM pass entirely.
    taps = [x[:, :, i:i + Ho, j:j + Wo] for i in range(kh) for j in range(kw)]
    patches = jnp.stack(taps, axis=0).reshape(IN_FEATURES, n).astype(jnp.float32)

    rows = _round_up(max(1, pl.cdiv(n, LANES)), CHUNK_ROWS)
    n_chunks_total = rows // CHUNK_ROWS

    # Grid sizing: keep the "parallel" axis even and >= 4 steps when the
    # problem is large enough, so a v7x megacore gets >= 2 balanced steps per
    # TensorCore; single step only for tiny problems.
    if n_chunks_total <= 1:
        grid_n = 1
    else:
        grid_n = max(4, pl.cdiv(rows, MAX_BLOCK_ROWS))
        if grid_n % 2:
            grid_n += 1
        grid_n = min(grid_n, n_chunks_total)
        if grid_n > 1 and grid_n % 2:
            grid_n -= 1
    tr = _round_up(pl.cdiv(rows, grid_n), CHUNK_ROWS)
    rows_pad = tr * grid_n
    n_pad = rows_pad * LANES

    patches = jnp.pad(patches, ((0, 0), (0, n_pad - n)))
    patches = patches.reshape(IN_FEATURES, rows_pad, LANES)

    # Fold the B-spline normalization into the spline weights (host-side, free).
    sw_kernel = (scaled_spline_weight.astype(jnp.float32) * INV_NORM)
    bw_kernel = base_weight.astype(jnp.float32)

    out = pl.pallas_call(
        kan_conv_kernel,
        out_shape=jax.ShapeDtypeStruct((rows_pad, LANES), jnp.float32),
        grid_spec=pltpu.PrefetchScalarGridSpec(
            num_scalar_prefetch=0,
            grid=(grid_n,),
            in_specs=[
                pl.BlockSpec((IN_FEATURES, tr, LANES), lambda i: (0, i, 0)),
                pl.BlockSpec(memory_space=pltpu.MemorySpace.SMEM),
                pl.BlockSpec(memory_space=pltpu.MemorySpace.SMEM),
            ],
            out_specs=pl.BlockSpec((tr, LANES), lambda i: (i, 0)),
        ),
        compiler_params=pltpu.CompilerParams(
            dimension_semantics=("parallel",),
            vmem_limit_bytes=32 * 1024 * 1024,
        ),
    )(patches, bw_kernel, sw_kernel)

    return out.reshape(-1)[:n].reshape(B, C, Ho, Wo)


# ---- Pure-JAX reference (same math as the PyTorch module) -------------------
def reference_forward(x, base_weight, scaled_spline_weight):
    B, C, H, W = x.shape
    kh, kw = KERNEL_SIZE
    Ho, Wo = H - kh + 1, W - kw + 1
    taps = [x[:, :, i:i + Ho, j:j + Wo] for i in range(kh) for j in range(kw)]
    p = jnp.stack(taps, axis=0).reshape(IN_FEATURES, -1)           # (4, N)
    base = jnp.sum(base_weight[:, None] * (p * jax.nn.sigmoid(p)), axis=0)
    bases = [((p >= KNOTS[t]) & (p < KNOTS[t + 1])).astype(p.dtype)
             for t in range(N_KNOTS - 1)]
    for k in range(1, SPLINE_ORDER + 1):
        bases = [
            (p - KNOTS[t]) / (KNOTS[t + k] - KNOTS[t]) * bases[t]
            + (KNOTS[t + k + 1] - p) / (KNOTS[t + k + 1] - KNOTS[t + 1]) * bases[t + 1]
            for t in range(len(bases) - 1)
        ]
    spline = sum(jnp.sum(scaled_spline_weight[:, t:t + 1] * bases[t], axis=0)
                 for t in range(NUM_BASES))
    return (base + spline).reshape(B, C, Ho, Wo)


if __name__ == "__main__":
    key = jax.random.PRNGKey(0)
    k_x, k_bw, k_sw, k_sc = jax.random.split(key, 4)

    # Deterministic synthetic parameters (shapes match KANLinear(in=4, out=1)).
    B, C, H, W = 2, 4, 16, 16
    x = jax.random.normal(k_x, (B, C, H, W), dtype=jnp.float32)

    scale_base, scale_spline = 1.0, 1.0
    base_weight_full = scale_base * jax.random.normal(
        k_bw, (OUT_FEATURES, IN_FEATURES), jnp.float32)
    spline_weight = 0.1 * jax.random.normal(
        k_sw, (OUT_FEATURES, IN_FEATURES, NUM_BASES), jnp.float32)
    spline_scaler = scale_spline * jax.random.normal(
        k_sc, (OUT_FEATURES, IN_FEATURES), jnp.float32)

    # scaled_spline_weight = spline_weight * spline_scaler[..., None]
    scaled_spline_weight = (spline_weight * spline_scaler[..., None])[0]   # (4, 8)
    base_weight = base_weight_full[0]                                      # (4,)

    out = kan_convolution_forward(x, base_weight, scaled_spline_weight)
    jax.block_until_ready(out)

    ref = reference_forward(x, base_weight, scaled_spline_weight)
    assert out.shape == (B, C, H - 1, W - 1), out.shape
    max_err = float(jnp.max(jnp.abs(out - ref)))
    assert jnp.allclose(out, ref, atol=1e-4, rtol=1e-4), max_err

    print("KERNEL_OK")
</pallas_src>

<mosaic_0001>
module attributes {stable_mosaic.version = 11 : i64} {
  func.func @kan_conv_kernel(%arg0: i32, %arg1: memref<4x8x128xf32, #tpu.memory_space<vmem>>, %arg2: memref<4xf32, #tpu.memory_space<smem>>, %arg3: memref<4x8xf32, #tpu.memory_space<smem>>, %arg4: memref<8x128xf32, #tpu.memory_space<vmem>>) attributes {dimension_semantics = [#tpu.dimension_semantics<parallel>], iteration_bounds = array<i64: 2>, scalar_prefetch = 0 : i64, scratch_operands = 0 : i64, tpu.core_type = #tpu.core_type<tc>, window_params = [{transform_indices = @transform_0, window_bounds = array<i64: 4, 8, 128>}, {transform_indices = @transform_1, window_bounds = array<i64: 4>}, {transform_indices = @transform_2, window_bounds = array<i64: 4, 8>}, {transform_indices = @transform_3, window_bounds = array<i64: 8, 128>}]} {
    %c0 = arith.constant 0 : index
    %0 = memref.load %arg2[%c0] : memref<4xf32, #tpu.memory_space<smem>>
    %c1 = arith.constant 1 : index
    %1 = memref.load %arg2[%c1] : memref<4xf32, #tpu.memory_space<smem>>
    %c2 = arith.constant 2 : index
    %2 = memref.load %arg2[%c2] : memref<4xf32, #tpu.memory_space<smem>>
    %c3 = arith.constant 3 : index
    %3 = memref.load %arg2[%c3] : memref<4xf32, #tpu.memory_space<smem>>
    %c0_0 = arith.constant 0 : index
    %c0_1 = arith.constant 0 : index
    %4 = memref.load %arg3[%c0_0, %c0_1] : memref<4x8xf32, #tpu.memory_space<smem>>
    %c0_2 = arith.constant 0 : index
    %c1_3 = arith.constant 1 : index
    %5 = memref.load %arg3[%c0_2, %c1_3] : memref<4x8xf32, #tpu.memory_space<smem>>
    %c0_4 = arith.constant 0 : index
    %c2_5 = arith.constant 2 : index
    %6 = memref.load %arg3[%c0_4, %c2_5] : memref<4x8xf32, #tpu.memory_space<smem>>
    %c0_6 = arith.constant 0 : index
    %c3_7 = arith.constant 3 : index
    %7 = memref.load %arg3[%c0_6, %c3_7] : memref<4x8xf32, #tpu.memory_space<smem>>
    %c0_8 = arith.constant 0 : index
    %c4 = arith.constant 4 : index
    %8 = memref.load %arg3[%c0_8, %c4] : memref<4x8xf32, #tpu.memory_space<smem>>
    %c0_9 = arith.constant 0 : index
    %c5 = arith.constant 5 : index
    %9 = memref.load %arg3[%c0_9, %c5] : memref<4x8xf32, #tpu.memory_space<smem>>
    %c0_10 = arith.constant 0 : index
    %c6 = arith.constant 6 : index
    %10 = memref.load %arg3[%c0_10, %c6] : memref<4x8xf32, #tpu.memory_space<smem>>
    %c0_11 = arith.constant 0 : index
    %c7 = arith.constant 7 : index
    %11 = memref.load %arg3[%c0_11, %c7] : memref<4x8xf32, #tpu.memory_space<smem>>
    %c1_12 = arith.constant 1 : index
    %c0_13 = arith.constant 0 : index
    %12 = memref.load %arg3[%c1_12, %c0_13] : memref<4x8xf32, #tpu.memory_space<smem>>
    %c1_14 = arith.constant 1 : index
    %c1_15 = arith.constant 1 : index
    %13 = memref.load %arg3[%c1_14, %c1_15] : memref<4x8xf32, #tpu.memory_space<smem>>
    %c1_16 = arith.constant 1 : index
    %c2_17 = arith.constant 2 : index
    %14 = memref.load %arg3[%c1_16, %c2_17] : memref<4x8xf32, #tpu.memory_space<smem>>
    %c1_18 = arith.constant 1 : index
    %c3_19 = arith.constant 3 : index
    %15 = memref.load %arg3[%c1_18, %c3_19] : memref<4x8xf32, #tpu.memory_space<smem>>
    %c1_20 = arith.constant 1 : index
    %c4_21 = arith.constant 4 : index
    %16 = memref.load %arg3[%c1_20, %c4_21] : memref<4x8xf32, #tpu.memory_space<smem>>
    %c1_22 = arith.constant 1 : index
    %c5_23 = arith.constant 5 : index
    %17 = memref.load %arg3[%c1_22, %c5_23] : memref<4x8xf32, #tpu.memory_space<smem>>
    %c1_24 = arith.constant 1 : index
    %c6_25 = arith.constant 6 : index
    %18 = memref.load %arg3[%c1_24, %c6_25] : memref<4x8xf32, #tpu.memory_space<smem>>
    %c1_26 = arith.constant 1 : index
    %c7_27 = arith.constant 7 : index
    %19 = memref.load %arg3[%c1_26, %c7_27] : memref<4x8xf32, #tpu.memory_space<smem>>
    %c2_28 = arith.constant 2 : index
    %c0_29 = arith.constant 0 : index
    %20 = memref.load %arg3[%c2_28, %c0_29] : memref<4x8xf32, #tpu.memory_space<smem>>
    %c2_30 = arith.constant 2 : index
    %c1_31 = arith.constant 1 : index
    %21 = memref.load %arg3[%c2_30, %c1_31] : memref<4x8xf32, #tpu.memory_space<smem>>
    %c2_32 = arith.constant 2 : index
    %c2_33 = arith.constant 2 : index
    %22 = memref.load %arg3[%c2_32, %c2_33] : memref<4x8xf32, #tpu.memory_space<smem>>
    %c2_34 = arith.constant 2 : index
    %c3_35 = arith.constant 3 : index
    %23 = memref.load %arg3[%c2_34, %c3_35] : memref<4x8xf32, #tpu.memory_space<smem>>
    %c2_36 = arith.constant 2 : index
    %c4_37 = arith.constant 4 : index
    %24 = memref.load %arg3[%c2_36, %c4_37] : memref<4x8xf32, #tpu.memory_space<smem>>
    %c2_38 = arith.constant 2 : index
    %c5_39 = arith.constant 5 : index
    %25 = memref.load %arg3[%c2_38, %c5_39] : memref<4x8xf32, #tpu.memory_space<smem>>
    %c2_40 = arith.constant 2 : index
    %c6_41 = arith.constant 6 : index
    %26 = memref.load %arg3[%c2_40, %c6_41] : memref<4x8xf32, #tpu.memory_space<smem>>
    %c2_42 = arith.constant 2 : index
    %c7_43 = arith.constant 7 : index
    %27 = memref.load %arg3[%c2_42, %c7_43] : memref<4x8xf32, #tpu.memory_space<smem>>
    %c3_44 = arith.constant 3 : index
    %c0_45 = arith.constant 0 : index
    %28 = memref.load %arg3[%c3_44, %c0_45] : memref<4x8xf32, #tpu.memory_space<smem>>
    %c3_46 = arith.constant 3 : index
    %c1_47 = arith.constant 1 : index
    %29 = memref.load %arg3[%c3_46, %c1_47] : memref<4x8xf32, #tpu.memory_space<smem>>
    %c3_48 = arith.constant 3 : index
    %c2_49 = arith.constant 2 : index
    %30 = memref.load %arg3[%c3_48, %c2_49] : memref<4x8xf32, #tpu.memory_space<smem>>
    %c3_50 = arith.constant 3 : index
    %c3_51 = arith.constant 3 : index
    %31 = memref.load %arg3[%c3_50, %c3_51] : memref<4x8xf32, #tpu.memory_space<smem>>
    %c3_52 = arith.constant 3 : index
    %c4_53 = arith.constant 4 : index
    %32 = memref.load %arg3[%c3_52, %c4_53] : memref<4x8xf32, #tpu.memory_space<smem>>
    %c3_54 = arith.constant 3 : index
    %c5_55 = arith.constant 5 : index
    %33 = memref.load %arg3[%c3_54, %c5_55] : memref<4x8xf32, #tpu.memory_space<smem>>
    %c3_56 = arith.constant 3 : index
    %c6_57 = arith.constant 6 : index
    %34 = memref.load %arg3[%c3_56, %c6_57] : memref<4x8xf32, #tpu.memory_space<smem>>
    %c3_58 = arith.constant 3 : index
    %c7_59 = arith.constant 7 : index
    %35 = memref.load %arg3[%c3_58, %c7_59] : memref<4x8xf32, #tpu.memory_space<smem>>
    %c0_i32 = arith.constant 0 : i32
    %c1_i32 = arith.constant 1 : i32
    %36 = arith.muli %c0_i32, %c1_i32 : i32
    %c0_i32_60 = arith.constant 0 : i32
    %37 = arith.addi %c0_i32_60, %36 : i32
    %c8_i32 = arith.constant 8 : i32
    %38 = arith.muli %37, %c8_i32 : i32
    %39 = tpu.assume_multiple %38, 8 : i32
    %c0_61 = arith.constant 0 : index
    %40 = arith.index_cast %39 : i32 to index
    %c0_62 = arith.constant 0 : index
    %41 = vector.load %arg1[%c0_61, %40, %c0_62] : memref<4x8x128xf32, #tpu.memory_space<vmem>>, vector<1x8x128xf32>
    %42 = vector.shape_cast %41 : vector<1x8x128xf32> to vector<8x128xf32>
    %43 = arith.negf %42 : vector<8x128xf32>
    %44 = math.exp %43 : vector<8x128xf32>
    %cst = arith.constant 1.000000e+00 : f32
    %45 = vector.broadcast %cst : f32 to vector<8x128xf32>
    %46 = arith.addf %45, %44 : vector<8x128xf32>
    %47 = arith.divf %45, %46 : vector<8x128xf32>
    %48 = arith.mulf %42, %47 : vector<8x128xf32>
    %49 = vector.broadcast %0 : f32 to vector<8x128xf32>
    %50 = arith.mulf %49, %48 : vector<8x128xf32>
    %cst_63 = arith.constant -2.200000e+00 : f32
    %51 = vector.broadcast %cst_63 : f32 to vector<8x128xf32>
    %52 = arith.subf %42, %51 : vector<8x128xf32>
    %cst_64 = arith.constant -1.800000e+00 : f32
    %53 = vector.broadcast %cst_64 : f32 to vector<8x128xf32>
    %54 = arith.subf %42, %53 : vector<8x128xf32>
    %cst_65 = arith.constant -1.400000e+00 : f32
    %55 = vector.broadcast %cst_65 : f32 to vector<8x128xf32>
    %56 = arith.subf %42, %55 : vector<8x128xf32>
    %cst_66 = arith.constant -1.000000e+00 : f32
    %57 = vector.broadcast %cst_66 : f32 to vector<8x128xf32>
    %58 = arith.subf %42, %57 : vector<8x128xf32>
    %cst_67 = arith.constant -6.000000e-01 : f32
    %59 = vector.broadcast %cst_67 : f32 to vector<8x128xf32>
    %60 = arith.subf %42, %59 : vector<8x128xf32>
    %cst_68 = arith.constant -2.000000e-01 : f32
    %61 = vector.broadcast %cst_68 : f32 to vector<8x128xf32>
    %62 = arith.subf %42, %61 : vector<8x128xf32>
    %cst_69 = arith.constant 2.000000e-01 : f32
    %63 = vector.broadcast %cst_69 : f32 to vector<8x128xf32>
    %64 = arith.subf %42, %63 : vector<8x128xf32>
    %cst_70 = arith.constant 6.000000e-01 : f32
    %65 = vector.broadcast %cst_70 : f32 to vector<8x128xf32>
    %66 = arith.subf %42, %65 : vector<8x128xf32>
    %cst_71 = arith.constant 1.000000e+00 : f32
    %67 = vector.broadcast %cst_71 : f32 to vector<8x128xf32>
    %68 = arith.subf %42, %67 : vector<8x128xf32>
    %cst_72 = arith.constant 1.400000e+00 : f32
    %69 = vector.broadcast %cst_72 : f32 to vector<8x128xf32>
    %70 = arith.subf %42, %69 : vector<8x128xf32>
    %cst_73 = arith.constant 1.800000e+00 : f32
    %71 = vector.broadcast %cst_73 : f32 to vector<8x128xf32>
    %72 = arith.subf %42, %71 : vector<8x128xf32>
    %cst_74 = arith.constant 2.200000e+00 : f32
    %73 = vector.broadcast %cst_74 : f32 to vector<8x128xf32>
    %74 = arith.subf %42, %73 : vector<8x128xf32>
    %cst_75 = arith.constant -2.200000e+00 : f32
    %75 = vector.broadcast %cst_75 : f32 to vector<8x128xf32>
    %76 = arith.cmpf oge, %42, %75 : vector<8x128xf32>
    %77 = arith.extui %76 : vector<8x128xi1> to vector<8x128xi32>
    %78 = arith.sitofp %77 : vector<8x128xi32> to vector<8x128xf32>
    %cst_76 = arith.constant -1.800000e+00 : f32
    %79 = vector.broadcast %cst_76 : f32 to vector<8x128xf32>
    %80 = arith.cmpf oge, %42, %79 : vector<8x128xf32>
    %81 = arith.extui %80 : vector<8x128xi1> to vector<8x128xi32>
    %82 = arith.sitofp %81 : vector<8x128xi32> to vector<8x128xf32>
    %cst_77 = arith.constant -1.400000e+00 : f32
    %83 = vector.broadcast %cst_77 : f32 to vector<8x128xf32>
    %84 = arith.cmpf oge, %42, %83 : vector<8x128xf32>
    %85 = arith.extui %84 : vector<8x128xi1> to vector<8x128xi32>
    %86 = arith.sitofp %85 : vector<8x128xi32> to vector<8x128xf32>
    %cst_78 = arith.constant -1.000000e+00 : f32
    %87 = vector.broadcast %cst_78 : f32 to vector<8x128xf32>
    %88 = arith.cmpf oge, %42, %87 : vector<8x128xf32>
    %89 = arith.extui %88 : vector<8x128xi1> to vector<8x128xi32>
    %90 = arith.sitofp %89 : vector<8x128xi32> to vector<8x128xf32>
    %cst_79 = arith.constant -6.000000e-01 : f32
    %91 = vector.broadcast %cst_79 : f32 to vector<8x128xf32>
    %92 = arith.cmpf oge, %42, %91 : vector<8x128xf32>
    %93 = arith.extui %92 : vector<8x128xi1> to vector<8x128xi32>
    %94 = arith.sitofp %93 : vector<8x128xi32> to vector<8x128xf32>
    %cst_80 = arith.constant -2.000000e-01 : f32
    %95 = vector.broadcast %cst_80 : f32 to vector<8x128xf32>
    %96 = arith.cmpf oge, %42, %95 : vector<8x128xf32>
    %97 = arith.extui %96 : vector<8x128xi1> to vector<8x128xi32>
    %98 = arith.sitofp %97 : vector<8x128xi32> to vector<8x128xf32>
    %cst_81 = arith.constant 2.000000e-01 : f32
    %99 = vector.broadcast %cst_81 : f32 to vector<8x128xf32>
    %100 = arith.cmpf oge, %42, %99 : vector<8x128xf32>
    %101 = arith.extui %100 : vector<8x128xi1> to vector<8x128xi32>
    %102 = arith.sitofp %101 : vector<8x128xi32> to vector<8x128xf32>
    %cst_82 = arith.constant 6.000000e-01 : f32
    %103 = vector.broadcast %cst_82 : f32 to vector<8x128xf32>
    %104 = arith.cmpf oge, %42, %103 : vector<8x128xf32>
    %105 = arith.extui %104 : vector<8x128xi1> to vector<8x128xi32>
    %106 = arith.sitofp %105 : vector<8x128xi32> to vector<8x128xf32>
    %cst_83 = arith.constant 1.000000e+00 : f32
    %107 = vector.broadcast %cst_83 : f32 to vector<8x128xf32>
    %108 = arith.cmpf oge, %42, %107 : vector<8x128xf32>
    %109 = arith.extui %108 : vector<8x128xi1> to vector<8x128xi32>
    %110 = arith.sitofp %109 : vector<8x128xi32> to vector<8x128xf32>
    %cst_84 = arith.constant 1.400000e+00 : f32
    %111 = vector.broadcast %cst_84 : f32 to vector<8x128xf32>
    %112 = arith.cmpf oge, %42, %111 : vector<8x128xf32>
    %113 = arith.extui %112 : vector<8x128xi1> to vector<8x128xi32>
    %114 = arith.sitofp %113 : vector<8x128xi32> to vector<8x128xf32>
    %cst_85 = arith.constant 1.800000e+00 : f32
    %115 = vector.broadcast %cst_85 : f32 to vector<8x128xf32>
    %116 = arith.cmpf oge, %42, %115 : vector<8x128xf32>
    %117 = arith.extui %116 : vector<8x128xi1> to vector<8x128xi32>
    %118 = arith.sitofp %117 : vector<8x128xi32> to vector<8x128xf32>
    %cst_86 = arith.constant 2.200000e+00 : f32
    %119 = vector.broadcast %cst_86 : f32 to vector<8x128xf32>
    %120 = arith.cmpf oge, %42, %119 : vector<8x128xf32>
    %121 = arith.extui %120 : vector<8x128xi1> to vector<8x128xi32>
    %122 = arith.sitofp %121 : vector<8x128xi32> to vector<8x128xf32>
    %123 = arith.subf %78, %82 : vector<8x128xf32>
    %124 = arith.subf %82, %86 : vector<8x128xf32>
    %125 = arith.subf %86, %90 : vector<8x128xf32>
    %126 = arith.subf %90, %94 : vector<8x128xf32>
    %127 = arith.subf %94, %98 : vector<8x128xf32>
    %128 = arith.subf %98, %102 : vector<8x128xf32>
    %129 = arith.subf %102, %106 : vector<8x128xf32>
    %130 = arith.subf %106, %110 : vector<8x128xf32>
    %131 = arith.subf %110, %114 : vector<8x128xf32>
    %132 = arith.subf %114, %118 : vector<8x128xf32>
    %133 = arith.subf %118, %122 : vector<8x128xf32>
    %134 = arith.mulf %52, %123 : vector<8x128xf32>
    %135 = arith.mulf %56, %124 : vector<8x128xf32>
    %136 = arith.subf %134, %135 : vector<8x128xf32>
    %137 = arith.mulf %54, %124 : vector<8x128xf32>
    %138 = arith.mulf %58, %125 : vector<8x128xf32>
    %139 = arith.subf %137, %138 : vector<8x128xf32>
    %140 = arith.mulf %56, %125 : vector<8x128xf32>
    %141 = arith.mulf %60, %126 : vector<8x128xf32>
    %142 = arith.subf %140, %141 : vector<8x128xf32>
    %143 = arith.mulf %58, %126 : vector<8x128xf32>
    %144 = arith.mulf %62, %127 : vector<8x128xf32>
    %145 = arith.subf %143, %144 : vector<8x128xf32>
    %146 = arith.mulf %60, %127 : vector<8x128xf32>
    %147 = arith.mulf %64, %128 : vector<8x128xf32>
    %148 = arith.subf %146, %147 : vector<8x128xf32>
    %149 = arith.mulf %62, %128 : vector<8x128xf32>
    %150 = arith.mulf %66, %129 : vector<8x128xf32>
    %151 = arith.subf %149, %150 : vector<8x128xf32>
    %152 = arith.mulf %64, %129 : vector<8x128xf32>
    %153 = arith.mulf %68, %130 : vector<8x128xf32>
    %154 = arith.subf %152, %153 : vector<8x128xf32>
    %155 = arith.mulf %66, %130 : vector<8x128xf32>
    %156 = arith.mulf %70, %131 : vector<8x128xf32>
    %157 = arith.subf %155, %156 : vector<8x128xf32>
    %158 = arith.mulf %68, %131 : vector<8x128xf32>
    %159 = arith.mulf %72, %132 : vector<8x128xf32>
    %160 = arith.subf %158, %159 : vector<8x128xf32>
    %161 = arith.mulf %70, %132 : vector<8x128xf32>
    %162 = arith.mulf %74, %133 : vector<8x128xf32>
    %163 = arith.subf %161, %162 : vector<8x128xf32>
    %164 = arith.mulf %52, %136 : vector<8x128xf32>
    %165 = arith.mulf %58, %139 : vector<8x128xf32>
    %166 = arith.subf %164, %165 : vector<8x128xf32>
    %167 = arith.mulf %54, %139 : vector<8x128xf32>
    %168 = arith.mulf %60, %142 : vector<8x128xf32>
    %169 = arith.subf %167, %168 : vector<8x128xf32>
    %170 = arith.mulf %56, %142 : vector<8x128xf32>
    %171 = arith.mulf %62, %145 : vector<8x128xf32>
    %172 = arith.subf %170, %171 : vector<8x128xf32>
    %173 = arith.mulf %58, %145 : vector<8x128xf32>
    %174 = arith.mulf %64, %148 : vector<8x128xf32>
    %175 = arith.subf %173, %174 : vector<8x128xf32>
    %176 = arith.mulf %60, %148 : vector<8x128xf32>
    %177 = arith.mulf %66, %151 : vector<8x128xf32>
    %178 = arith.subf %176, %177 : vector<8x128xf32>
    %179 = arith.mulf %62, %151 : vector<8x128xf32>
    %180 = arith.mulf %68, %154 : vector<8x128xf32>
    %181 = arith.subf %179, %180 : vector<8x128xf32>
    %182 = arith.mulf %64, %154 : vector<8x128xf32>
    %183 = arith.mulf %70, %157 : vector<8x128xf32>
    %184 = arith.subf %182, %183 : vector<8x128xf32>
    %185 = arith.mulf %66, %157 : vector<8x128xf32>
    %186 = arith.mulf %72, %160 : vector<8x128xf32>
    %187 = arith.subf %185, %186 : vector<8x128xf32>
    %188 = arith.mulf %68, %160 : vector<8x128xf32>
    %189 = arith.mulf %74, %163 : vector<8x128xf32>
    %190 = arith.subf %188, %189 : vector<8x128xf32>
    %191 = arith.mulf %52, %166 : vector<8x128xf32>
    %192 = arith.mulf %60, %169 : vector<8x128xf32>
    %193 = arith.subf %191, %192 : vector<8x128xf32>
    %194 = arith.mulf %54, %169 : vector<8x128xf32>
    %195 = arith.mulf %62, %172 : vector<8x128xf32>
    %196 = arith.subf %194, %195 : vector<8x128xf32>
    %197 = arith.mulf %56, %172 : vector<8x128xf32>
    %198 = arith.mulf %64, %175 : vector<8x128xf32>
    %199 = arith.subf %197, %198 : vector<8x128xf32>
    %200 = arith.mulf %58, %175 : vector<8x128xf32>
    %201 = arith.mulf %66, %178 : vector<8x128xf32>
    %202 = arith.subf %200, %201 : vector<8x128xf32>
    %203 = arith.mulf %60, %178 : vector<8x128xf32>
    %204 = arith.mulf %68, %181 : vector<8x128xf32>
    %205 = arith.subf %203, %204 : vector<8x128xf32>
    %206 = arith.mulf %62, %181 : vector<8x128xf32>
    %207 = arith.mulf %70, %184 : vector<8x128xf32>
    %208 = arith.subf %206, %207 : vector<8x128xf32>
    %209 = arith.mulf %64, %184 : vector<8x128xf32>
    %210 = arith.mulf %72, %187 : vector<8x128xf32>
    %211 = arith.subf %209, %210 : vector<8x128xf32>
    %212 = arith.mulf %66, %187 : vector<8x128xf32>
    %213 = arith.mulf %74, %190 : vector<8x128xf32>
    %214 = arith.subf %212, %213 : vector<8x128xf32>
    %215 = vector.broadcast %4 : f32 to vector<8x128xf32>
    %216 = arith.mulf %215, %193 : vector<8x128xf32>
    %217 = vector.broadcast %5 : f32 to vector<8x128xf32>
    %218 = arith.mulf %217, %196 : vector<8x128xf32>
    %219 = arith.addf %216, %218 : vector<8x128xf32>
    %220 = vector.broadcast %6 : f32 to vector<8x128xf32>
    %221 = arith.mulf %220, %199 : vector<8x128xf32>
    %222 = vector.broadcast %7 : f32 to vector<8x128xf32>
    %223 = arith.mulf %222, %202 : vector<8x128xf32>
    %224 = arith.addf %221, %223 : vector<8x128xf32>
    %225 = arith.addf %219, %224 : vector<8x128xf32>
    %226 = vector.broadcast %8 : f32 to vector<8x128xf32>
    %227 = arith.mulf %226, %205 : vector<8x128xf32>
    %228 = vector.broadcast %9 : f32 to vector<8x128xf32>
    %229 = arith.mulf %228, %208 : vector<8x128xf32>
    %230 = arith.addf %227, %229 : vector<8x128xf32>
    %231 = vector.broadcast %10 : f32 to vector<8x128xf32>
    %232 = arith.mulf %231, %211 : vector<8x128xf32>
    %233 = vector.broadcast %11 : f32 to vector<8x128xf32>
    %234 = arith.mulf %233, %214 : vector<8x128xf32>
    %235 = arith.addf %232, %234 : vector<8x128xf32>
    %236 = arith.addf %230, %235 : vector<8x128xf32>
    %237 = arith.addf %225, %236 : vector<8x128xf32>
    %238 = arith.addf %50, %237 : vector<8x128xf32>
    %c1_87 = arith.constant 1 : index
    %239 = arith.index_cast %39 : i32 to index
    %c0_88 = arith.constant 0 : index
    %240 = vector.load %arg1[%c1_87, %239, %c0_88] : memref<4x8x128xf32, #tpu.memory_space<vmem>>, vector<1x8x128xf32>
    %241 = vector.shape_cast %240 : vector<1x8x128xf32> to vector<8x128xf32>
    %242 = arith.negf %241 : vector<8x128xf32>
    %243 = math.exp %242 : vector<8x128xf32>
    %cst_89 = arith.constant 1.000000e+00 : f32
    %244 = vector.broadcast %cst_89 : f32 to vector<8x128xf32>
    %245 = arith.addf %244, %243 : vector<8x128xf32>
    %246 = arith.divf %244, %245 : vector<8x128xf32>
    %247 = arith.mulf %241, %246 : vector<8x128xf32>
    %248 = vector.broadcast %1 : f32 to vector<8x128xf32>
    %249 = arith.mulf %248, %247 : vector<8x128xf32>
    %cst_90 = arith.constant -2.200000e+00 : f32
    %250 = vector.broadcast %cst_90 : f32 to vector<8x128xf32>
    %251 = arith.subf %241, %250 : vector<8x128xf32>
    %cst_91 = arith.constant -1.800000e+00 : f32
    %252 = vector.broadcast %cst_91 : f32 to vector<8x128xf32>
    %253 = arith.subf %241, %252 : vector<8x128xf32>
    %cst_92 = arith.constant -1.400000e+00 : f32
    %254 = vector.broadcast %cst_92 : f32 to vector<8x128xf32>
    %255 = arith.subf %241, %254 : vector<8x128xf32>
    %cst_93 = arith.constant -1.000000e+00 : f32
    %256 = vector.broadcast %cst_93 : f32 to vector<8x128xf32>
    %257 = arith.subf %241, %256 : vector<8x128xf32>
    %cst_94 = arith.constant -6.000000e-01 : f32
    %258 = vector.broadcast %cst_94 : f32 to vector<8x128xf32>
    %259 = arith.subf %241, %258 : vector<8x128xf32>
    %cst_95 = arith.constant -2.000000e-01 : f32
    %260 = vector.broadcast %cst_95 : f32 to vector<8x128xf32>
    %261 = arith.subf %241, %260 : vector<8x128xf32>
    %cst_96 = arith.constant 2.000000e-01 : f32
    %262 = vector.broadcast %cst_96 : f32 to vector<8x128xf32>
    %263 = arith.subf %241, %262 : vector<8x128xf32>
    %cst_97 = arith.constant 6.000000e-01 : f32
    %264 = vector.broadcast %cst_97 : f32 to vector<8x128xf32>
    %265 = arith.subf %241, %264 : vector<8x128xf32>
    %cst_98 = arith.constant 1.000000e+00 : f32
    %266 = vector.broadcast %cst_98 : f32 to vector<8x128xf32>
    %267 = arith.subf %241, %266 : vector<8x128xf32>
    %cst_99 = arith.constant 1.400000e+00 : f32
    %268 = vector.broadcast %cst_99 : f32 to vector<8x128xf32>
    %269 = arith.subf %241, %268 : vector<8x128xf32>
    %cst_100 = arith.constant 1.800000e+00 : f32
    %270 = vector.broadcast %cst_100 : f32 to vector<8x128xf32>
    %271 = arith.subf %241, %270 : vector<8x128xf32>
    %cst_101 = arith.constant 2.200000e+00 : f32
    %272 = vector.broadcast %cst_101 : f32 to vector<8x128xf32>
    %273 = arith.subf %241, %272 : vector<8x128xf32>
    %cst_102 = arith.constant -2.200000e+00 : f32
    %274 = vector.broadcast %cst_102 : f32 to vector<8x128xf32>
    %275 = arith.cmpf oge, %241, %274 : vector<8x128xf32>
    %276 = arith.extui %275 : vector<8x128xi1> to vector<8x128xi32>
    %277 = arith.sitofp %276 : vector<8x128xi32> to vector<8x128xf32>
    %cst_103 = arith.constant -1.800000e+00 : f32
    %278 = vector.broadcast %cst_103 : f32 to vector<8x128xf32>
    %279 = arith.cmpf oge, %241, %278 : vector<8x128xf32>
    %280 = arith.extui %279 : vector<8x128xi1> to vector<8x128xi32>
    %281 = arith.sitofp %280 : vector<8x128xi32> to vector<8x128xf32>
    %cst_104 = arith.constant -1.400000e+00 : f32
    %282 = vector.broadcast %cst_104 : f32 to vector<8x128xf32>
    %283 = arith.cmpf oge, %241, %282 : vector<8x128xf32>
    %284 = arith.extui %283 : vector<8x128xi1> to vector<8x128xi32>
    %285 = arith.sitofp %284 : vector<8x128xi32> to vector<8x128xf32>
    %cst_105 = arith.constant -1.000000e+00 : f32
    %286 = vector.broadcast %cst_105 : f32 to vector<8x128xf32>
    %287 = arith.cmpf oge, %241, %286 : vector<8x128xf32>
    %288 = arith.extui %287 : vector<8x128xi1> to vector<8x128xi32>
    %289 = arith.sitofp %288 : vector<8x128xi32> to vector<8x128xf32>
    %cst_106 = arith.constant -6.000000e-01 : f32
    %290 = vector.broadcast %cst_106 : f32 to vector<8x128xf32>
    %291 = arith.cmpf oge, %241, %290 : vector<8x128xf32>
    %292 = arith.extui %291 : vector<8x128xi1> to vector<8x128xi32>
    %293 = arith.sitofp %292 : vector<8x128xi32> to vector<8x128xf32>
    %cst_107 = arith.constant -2.000000e-01 : f32
    %294 = vector.broadcast %cst_107 : f32 to vector<8x128xf32>
    %295 = arith.cmpf oge, %241, %294 : vector<8x128xf32>
    %296 = arith.extui %295 : vector<8x128xi1> to vector<8x128xi32>
    %297 = arith.sitofp %296 : vector<8x128xi32> to vector<8x128xf32>
    %cst_108 = arith.constant 2.000000e-01 : f32
    %298 = vector.broadcast %cst_108 : f32 to vector<8x128xf32>
    %299 = arith.cmpf oge, %241, %298 : vector<8x128xf32>
    %300 = arith.extui %299 : vector<8x128xi1> to vector<8x128xi32>
    %301 = arith.sitofp %300 : vector<8x128xi32> to vector<8x128xf32>
    %cst_109 = arith.constant 6.000000e-01 : f32
    %302 = vector.broadcast %cst_109 : f32 to vector<8x128xf32>
    %303 = arith.cmpf oge, %241, %302 : vector<8x128xf32>
    %304 = arith.extui %303 : vector<8x128xi1> to vector<8x128xi32>
    %305 = arith.sitofp %304 : vector<8x128xi32> to vector<8x128xf32>
    %cst_110 = arith.constant 1.000000e+00 : f32
    %306 = vector.broadcast %cst_110 : f32 to vector<8x128xf32>
    %307 = arith.cmpf oge, %241, %306 : vector<8x128xf32>
    %308 = arith.extui %307 : vector<8x128xi1> to vector<8x128xi32>
    %309 = arith.sitofp %308 : vector<8x128xi32> to vector<8x128xf32>
    %cst_111 = arith.constant 1.400000e+00 : f32
    %310 = vector.broadcast %cst_111 : f32 to vector<8x128xf32>
    %311 = arith.cmpf oge, %241, %310 : vector<8x128xf32>
    %312 = arith.extui %311 : vector<8x128xi1> to vector<8x128xi32>
    %313 = arith.sitofp %312 : vector<8x128xi32> to vector<8x128xf32>
    %cst_112 = arith.constant 1.800000e+00 : f32
    %314 = vector.broadcast %cst_112 : f32 to vector<8x128xf32>
    %315 = arith.cmpf oge, %241, %314 : vector<8x128xf32>
    %316 = arith.extui %315 : vector<8x128xi1> to vector<8x128xi32>
    %317 = arith.sitofp %316 : vector<8x128xi32> to vector<8x128xf32>
    %cst_113 = arith.constant 2.200000e+00 : f32
    %318 = vector.broadcast %cst_113 : f32 to vector<8x128xf32>
    %319 = arith.cmpf oge, %241, %318 : vector<8x128xf32>
    %320 = arith.extui %319 : vector<8x128xi1> to vector<8x128xi32>
    %321 = arith.sitofp %320 : vector<8x128xi32> to vector<8x128xf32>
    %322 = arith.subf %277, %281 : vector<8x128xf32>
    %323 = arith.subf %281, %285 : vector<8x128xf32>
    %324 = arith.subf %285, %289 : vector<8x128xf32>
    %325 = arith.subf %289, %293 : vector<8x128xf32>
    %326 = arith.subf %293, %297 : vector<8x128xf32>
    %327 = arith.subf %297, %301 : vector<8x128xf32>
    %328 = arith.subf %301, %305 : vector<8x128xf32>
    %329 = arith.subf %305, %309 : vector<8x128xf32>
    %330 = arith.subf %309, %313 : vector<8x128xf32>
    %331 = arith.subf %313, %317 : vector<8x128xf32>
    %332 = arith.subf %317, %321 : vector<8x128xf32>
    %333 = arith.mulf %251, %322 : vector<8x128xf32>
    %334 = arith.mulf %255, %323 : vector<8x128xf32>
    %335 = arith.subf %333, %334 : vector<8x128xf32>
    %336 = arith.mulf %253, %323 : vector<8x128xf32>
    %337 = arith.mulf %257, %324 : vector<8x128xf32>
    %338 = arith.subf %336, %337 : vector<8x128xf32>
    %339 = arith.mulf %255, %324 : vector<8x128xf32>
    %340 = arith.mulf %259, %325 : vector<8x128xf32>
    %341 = arith.subf %339, %340 : vector<8x128xf32>
    %342 = arith.mulf %257, %325 : vector<8x128xf32>
    %343 = arith.mulf %261, %326 : vector<8x128xf32>
    %344 = arith.subf %342, %343 : vector<8x128xf32>
    %345 = arith.mulf %259, %326 : vector<8x128xf32>
    %346 = arith.mulf %263, %327 : vector<8x128xf32>
    %347 = arith.subf %345, %346 : vector<8x128xf32>
    %348 = arith.mulf %261, %327 : vector<8x128xf32>
    %349 = arith.mulf %265, %328 : vector<8x128xf32>
    %350 = arith.subf %348, %349 : vector<8x128xf32>
    %351 = arith.mulf %263, %328 : vector<8x128xf32>
    %352 = arith.mulf %267, %329 : vector<8x128xf32>
    %353 = arith.subf %351, %352 : vector<8x128xf32>
    %354 = arith.mulf %265, %329 : vector<8x128xf32>
    %355 = arith.mulf %269, %330 : vector<8x128xf32>
    %356 = arith.subf %354, %355 : vector<8x128xf32>
    %357 = arith.mulf %267, %330 : vector<8x128xf32>
    %358 = arith.mulf %271, %331 : vector<8x128xf32>
    %359 = arith.subf %357, %358 : vector<8x128xf32>
    %360 = arith.mulf %269, %331 : vector<8x128xf32>
    %361 = arith.mulf %273, %332 : vector<8x128xf32>
    %362 = arith.subf %360, %361 : vector<8x128xf32>
    %363 = arith.mulf %251, %335 : vector<8x128xf32>
    %364 = arith.mulf %257, %338 : vector<8x128xf32>
    %365 = arith.subf %363, %364 : vector<8x128xf32>
    %366 = arith.mulf %253, %338 : vector<8x128xf32>
    %367 = arith.mulf %259, %341 : vector<8x128xf32>
    %368 = arith.subf %366, %367 : vector<8x128xf32>
    %369 = arith.mulf %255, %341 : vector<8x128xf32>
    %370 = arith.mulf %261, %344 : vector<8x128xf32>
    %371 = arith.subf %369, %370 : vector<8x128xf32>
    %372 = arith.mulf %257, %344 : vector<8x128xf32>
    %373 = arith.mulf %263, %347 : vector<8x128xf32>
    %374 = arith.subf %372, %373 : vector<8x128xf32>
    %375 = arith.mulf %259, %347 : vector<8x128xf32>
    %376 = arith.mulf %265, %350 : vector<8x128xf32>
    %377 = arith.subf %375, %376 : vector<8x128xf32>
    %378 = arith.mulf %261, %350 : vector<8x128xf32>
    %379 = arith.mulf %267, %353 : vector<8x128xf32>
    %380 = arith.subf %378, %379 : vector<8x128xf32>
    %381 = arith.mulf %263, %353 : vector<8x128xf32>
    %382 = arith.mulf %269, %356 : vector<8x128xf32>
    %383 = arith.subf %381, %382 : vector<8x128xf32>
    %384 = arith.mulf %265, %356 : vector<8x128xf32>
    %385 = arith.mulf %271, %359 : vector<8x128xf32>
    %386 = arith.subf %384, %385 : vector<8x128xf32>
    %387 = arith.mulf %267, %359 : vector<8x128xf32>
    %388 = arith.mulf %273, %362 : vector<8x128xf32>
    %389 = arith.subf %387, %388 : vector<8x128xf32>
    %390 = arith.mulf %251, %365 : vector<8x128xf32>
    %391 = arith.mulf %259, %368 : vector<8x128xf32>
    %392 = arith.subf %390, %391 : vector<8x128xf32>
    %393 = arith.mulf %253, %368 : vector<8x128xf32>
    %394 = arith.mulf %261, %371 : vector<8x128xf32>
    %395 = arith.subf %393, %394 : vector<8x128xf32>
    %396 = arith.mulf %255, %371 : vector<8x128xf32>
    %397 = arith.mulf %263, %374 : vector<8x128xf32>
    %398 = arith.subf %396, %397 : vector<8x128xf32>
    %399 = arith.mulf %257, %374 : vector<8x128xf32>
    %400 = arith.mulf %265, %377 : vector<8x128xf32>
    %401 = arith.subf %399, %400 : vector<8x128xf32>
    %402 = arith.mulf %259, %377 : vector<8x128xf32>
    %403 = arith.mulf %267, %380 : vector<8x128xf32>
    %404 = arith.subf %402, %403 : vector<8x128xf32>
    %405 = arith.mulf %261, %380 : vector<8x128xf32>
    %406 = arith.mulf %269, %383 : vector<8x128xf32>
    %407 = arith.subf %405, %406 : vector<8x128xf32>
    %408 = arith.mulf %263, %383 : vector<8x128xf32>
    %409 = arith.mulf %271, %386 : vector<8x128xf32>
    %410 = arith.subf %408, %409 : vector<8x128xf32>
    %411 = arith.mulf %265, %386 : vector<8x128xf32>
    %412 = arith.mulf %273, %389 : vector<8x128xf32>
    %413 = arith.subf %411, %412 : vector<8x128xf32>
    %414 = vector.broadcast %12 : f32 to vector<8x128xf32>
    %415 = arith.mulf %414, %392 : vector<8x128xf32>
    %416 = vector.broadcast %13 : f32 to vector<8x128xf32>
    %417 = arith.mulf %416, %395 : vector<8x128xf32>
    %418 = arith.addf %415, %417 : vector<8x128xf32>
    %419 = vector.broadcast %14 : f32 to vector<8x128xf32>
    %420 = arith.mulf %419, %398 : vector<8x128xf32>
    %421 = vector.broadcast %15 : f32 to vector<8x128xf32>
    %422 = arith.mulf %421, %401 : vector<8x128xf32>
    %423 = arith.addf %420, %422 : vector<8x128xf32>
    %424 = arith.addf %418, %423 : vector<8x128xf32>
    %425 = vector.broadcast %16 : f32 to vector<8x128xf32>
    %426 = arith.mulf %425, %404 : vector<8x128xf32>
    %427 = vector.broadcast %17 : f32 to vector<8x128xf32>
    %428 = arith.mulf %427, %407 : vector<8x128xf32>
    %429 = arith.addf %426, %428 : vector<8x128xf32>
    %430 = vector.broadcast %18 : f32 to vector<8x128xf32>
    %431 = arith.mulf %430, %410 : vector<8x128xf32>
    %432 = vector.broadcast %19 : f32 to vector<8x128xf32>
    %433 = arith.mulf %432, %413 : vector<8x128xf32>
    %434 = arith.addf %431, %433 : vector<8x128xf32>
    %435 = arith.addf %429, %434 : vector<8x128xf32>
    %436 = arith.addf %424, %435 : vector<8x128xf32>
    %437 = arith.addf %249, %436 : vector<8x128xf32>
    %c2_114 = arith.constant 2 : index
    %438 = arith.index_cast %39 : i32 to index
    %c0_115 = arith.constant 0 : index
    %439 = vector.load %arg1[%c2_114, %438, %c0_115] : memref<4x8x128xf32, #tpu.memory_space<vmem>>, vector<1x8x128xf32>
    %440 = vector.shape_cast %439 : vector<1x8x128xf32> to vector<8x128xf32>
    %441 = arith.negf %440 : vector<8x128xf32>
    %442 = math.exp %441 : vector<8x128xf32>
    %cst_116 = arith.constant 1.000000e+00 : f32
    %443 = vector.broadcast %cst_116 : f32 to vector<8x128xf32>
    %444 = arith.addf %443, %442 : vector<8x128xf32>
    %445 = arith.divf %443, %444 : vector<8x128xf32>
    %446 = arith.mulf %440, %445 : vector<8x128xf32>
    %447 = vector.broadcast %2 : f32 to vector<8x128xf32>
    %448 = arith.mulf %447, %446 : vector<8x128xf32>
    %cst_117 = arith.constant -2.200000e+00 : f32
    %449 = vector.broadcast %cst_117 : f32 to vector<8x128xf32>
    %450 = arith.subf %440, %449 : vector<8x128xf32>
    %cst_118 = arith.constant -1.800000e+00 : f32
    %451 = vector.broadcast %cst_118 : f32 to vector<8x128xf32>
    %452 = arith.subf %440, %451 : vector<8x128xf32>
    %cst_119 = arith.constant -1.400000e+00 : f32
    %453 = vector.broadcast %cst_119 : f32 to vector<8x128xf32>
    %454 = arith.subf %440, %453 : vector<8x128xf32>
    %cst_120 = arith.constant -1.000000e+00 : f32
    %455 = vector.broadcast %cst_120 : f32 to vector<8x128xf32>
    %456 = arith.subf %440, %455 : vector<8x128xf32>
    %cst_121 = arith.constant -6.000000e-01 : f32
    %457 = vector.broadcast %cst_121 : f32 to vector<8x128xf32>
    %458 = arith.subf %440, %457 : vector<8x128xf32>
    %cst_122 = arith.constant -2.000000e-01 : f32
    %459 = vector.broadcast %cst_122 : f32 to vector<8x128xf32>
    %460 = arith.subf %440, %459 : vector<8x128xf32>
    %cst_123 = arith.constant 2.000000e-01 : f32
    %461 = vector.broadcast %cst_123 : f32 to vector<8x128xf32>
    %462 = arith.subf %440, %461 : vector<8x128xf32>
    %cst_124 = arith.constant 6.000000e-01 : f32
    %463 = vector.broadcast %cst_124 : f32 to vector<8x128xf32>
    %464 = arith.subf %440, %463 : vector<8x128xf32>
    %cst_125 = arith.constant 1.000000e+00 : f32
    %465 = vector.broadcast %cst_125 : f32 to vector<8x128xf32>
    %466 = arith.subf %440, %465 : vector<8x128xf32>
    %cst_126 = arith.constant 1.400000e+00 : f32
    %467 = vector.broadcast %cst_126 : f32 to vector<8x128xf32>
    %468 = arith.subf %440, %467 : vector<8x128xf32>
    %cst_127 = arith.constant 1.800000e+00 : f32
    %469 = vector.broadcast %cst_127 : f32 to vector<8x128xf32>
    %470 = arith.subf %440, %469 : vector<8x128xf32>
    %cst_128 = arith.constant 2.200000e+00 : f32
    %471 = vector.broadcast %cst_128 : f32 to vector<8x128xf32>
    %472 = arith.subf %440, %471 : vector<8x128xf32>
    %cst_129 = arith.constant -2.200000e+00 : f32
    %473 = vector.broadcast %cst_129 : f32 to vector<8x128xf32>
    %474 = arith.cmpf oge, %440, %473 : vector<8x128xf32>
    %475 = arith.extui %474 : vector<8x128xi1> to vector<8x128xi32>
    %476 = arith.sitofp %475 : vector<8x128xi32> to vector<8x128xf32>
    %cst_130 = arith.constant -1.800000e+00 : f32
    %477 = vector.broadcast %cst_130 : f32 to vector<8x128xf32>
    %478 = arith.cmpf oge, %440, %477 : vector<8x128xf32>
    %479 = arith.extui %478 : vector<8x128xi1> to vector<8x128xi32>
    %480 = arith.sitofp %479 : vector<8x128xi32> to vector<8x128xf32>
    %cst_131 = arith.constant -1.400000e+00 : f32
    %481 = vector.broadcast %cst_131 : f32 to vector<8x128xf32>
    %482 = arith.cmpf oge, %440, %481 : vector<8x128xf32>
    %483 = arith.extui %482 : vector<8x128xi1> to vector<8x128xi32>
    %484 = arith.sitofp %483 : vector<8x128xi32> to vector<8x128xf32>
    %cst_132 = arith.constant -1.000000e+00 : f32
    %485 = vector.broadcast %cst_132 : f32 to vector<8x128xf32>
    %486 = arith.cmpf oge, %440, %485 : vector<8x128xf32>
    %487 = arith.extui %486 : vector<8x128xi1> to vector<8x128xi32>
    %488 = arith.sitofp %487 : vector<8x128xi32> to vector<8x128xf32>
    %cst_133 = arith.constant -6.000000e-01 : f32
    %489 = vector.broadcast %cst_133 : f32 to vector<8x128xf32>
    %490 = arith.cmpf oge, %440, %489 : vector<8x128xf32>
    %491 = arith.extui %490 : vector<8x128xi1> to vector<8x128xi32>
    %492 = arith.sitofp %491 : vector<8x128xi32> to vector<8x128xf32>
    %cst_134 = arith.constant -2.000000e-01 : f32
    %493 = vector.broadcast %cst_134 : f32 to vector<8x128xf32>
    %494 = arith.cmpf oge, %440, %493 : vector<8x128xf32>
    %495 = arith.extui %494 : vector<8x128xi1> to vector<8x128xi32>
    %496 = arith.sitofp %495 : vector<8x128xi32> to vector<8x128xf32>
    %cst_135 = arith.constant 2.000000e-01 : f32
    %497 = vector.broadcast %cst_135 : f32 to vector<8x128xf32>
    %498 = arith.cmpf oge, %440, %497 : vector<8x128xf32>
    %499 = arith.extui %498 : vector<8x128xi1> to vector<8x128xi32>
    %500 = arith.sitofp %499 : vector<8x128xi32> to vector<8x128xf32>
    %cst_136 = arith.constant 6.000000e-01 : f32
    %501 = vector.broadcast %cst_136 : f32 to vector<8x128xf32>
    %502 = arith.cmpf oge, %440, %501 : vector<8x128xf32>
    %503 = arith.extui %502 : vector<8x128xi1> to vector<8x128xi32>
    %504 = arith.sitofp %503 : vector<8x128xi32> to vector<8x128xf32>
    %cst_137 = arith.constant 1.000000e+00 : f32
    %505 = vector.broadcast %cst_137 : f32 to vector<8x128xf32>
    %506 = arith.cmpf oge, %440, %505 : vector<8x128xf32>
    %507 = arith.extui %506 : vector<8x128xi1> to vector<8x128xi32>
    %508 = arith.sitofp %507 : vector<8x128xi32> to vector<8x128xf32>
    %cst_138 = arith.constant 1.400000e+00 : f32
    %509 = vector.broadcast %cst_138 : f32 to vector<8x128xf32>
    %510 = arith.cmpf oge, %440, %509 : vector<8x128xf32>
    %511 = arith.extui %510 : vector<8x128xi1> to vector<8x128xi32>
    %512 = arith.sitofp %511 : vector<8x128xi32> to vector<8x128xf32>
    %cst_139 = arith.constant 1.800000e+00 : f32
    %513 = vector.broadcast %cst_139 : f32 to vector<8x128xf32>
    %514 = arith.cmpf oge, %440, %513 : vector<8x128xf32>
    %515 = arith.extui %514 : vector<8x128xi1> to vector<8x128xi32>
    %516 = arith.sitofp %515 : vector<8x128xi32> to vector<8x128xf32>
    %cst_140 = arith.constant 2.200000e+00 : f32
    %517 = vector.broadcast %cst_140 : f32 to vector<8x128xf32>
    %518 = arith.cmpf oge, %440, %517 : vector<8x128xf32>
    %519 = arith.extui %518 : vector<8x128xi1> to vector<8x128xi32>
    %520 = arith.sitofp %519 : vector<8x128xi32> to vector<8x128xf32>
    %521 = arith.subf %476, %480 : vector<8x128xf32>
    %522 = arith.subf %480, %484 : vector<8x128xf32>
    %523 = arith.subf %484, %488 : vector<8x128xf32>
    %524 = arith.subf %488, %492 : vector<8x128xf32>
    %525 = arith.subf %492, %496 : vector<8x128xf32>
    %526 = arith.subf %496, %500 : vector<8x128xf32>
    %527 = arith.subf %500, %504 : vector<8x128xf32>
    %528 = arith.subf %504, %508 : vector<8x128xf32>
    %529 = arith.subf %508, %512 : vector<8x128xf32>
    %530 = arith.subf %512, %516 : vector<8x128xf32>
    %531 = arith.subf %516, %520 : vector<8x128xf32>
    %532 = arith.mulf %450, %521 : vector<8x128xf32>
    %533 = arith.mulf %454, %522 : vector<8x128xf32>
    %534 = arith.subf %532, %533 : vector<8x128xf32>
    %535 = arith.mulf %452, %522 : vector<8x128xf32>
    %536 = arith.mulf %456, %523 : vector<8x128xf32>
    %537 = arith.subf %535, %536 : vector<8x128xf32>
    %538 = arith.mulf %454, %523 : vector<8x128xf32>
    %539 = arith.mulf %458, %524 : vector<8x128xf32>
    %540 = arith.subf %538, %539 : vector<8x128xf32>
    %541 = arith.mulf %456, %524 : vector<8x128xf32>
    %542 = arith.mulf %460, %525 : vector<8x128xf32>
    %543 = arith.subf %541, %542 : vector<8x128xf32>
    %544 = arith.mulf %458, %525 : vector<8x128xf32>
    %545 = arith.mulf %462, %526 : vector<8x128xf32>
    %546 = arith.subf %544, %545 : vector<8x128xf32>
    %547 = arith.mulf %460, %526 : vector<8x128xf32>
    %548 = arith.mulf %464, %527 : vector<8x128xf32>
    %549 = arith.subf %547, %548 : vector<8x128xf32>
    %550 = arith.mulf %462, %527 : vector<8x128xf32>
    %551 = arith.mulf %466, %528 : vector<8x128xf32>
    %552 = arith.subf %550, %551 : vector<8x128xf32>
    %553 = arith.mulf %464, %528 : vector<8x128xf32>
    %554 = arith.mulf %468, %529 : vector<8x128xf32>
    %555 = arith.subf %553, %554 : vector<8x128xf32>
    %556 = arith.mulf %466, %529 : vector<8x128xf32>
    %557 = arith.mulf %470, %530 : vector<8x128xf32>
    %558 = arith.subf %556, %557 : vector<8x128xf32>
    %559 = arith.mulf %468, %530 : vector<8x128xf32>
    %560 = arith.mulf %472, %531 : vector<8x128xf32>
    %561 = arith.subf %559, %560 : vector<8x128xf32>
    %562 = arith.mulf %450, %534 : vector<8x128xf32>
    %563 = arith.mulf %456, %537 : vector<8x128xf32>
    %564 = arith.subf %562, %563 : vector<8x128xf32>
    %565 = arith.mulf %452, %537 : vector<8x128xf32>
    %566 = arith.mulf %458, %540 : vector<8x128xf32>
    %567 = arith.subf %565, %566 : vector<8x128xf32>
    %568 = arith.mulf %454, %540 : vector<8x128xf32>
    %569 = arith.mulf %460, %543 : vector<8x128xf32>
    %570 = arith.subf %568, %569 : vector<8x128xf32>
    %571 = arith.mulf %456, %543 : vector<8x128xf32>
    %572 = arith.mulf %462, %546 : vector<8x128xf32>
    %573 = arith.subf %571, %572 : vector<8x128xf32>
    %574 = arith.mulf %458, %546 : vector<8x128xf32>
    %575 = arith.mulf %464, %549 : vector<8x128xf32>
    %576 = arith.subf %574, %575 : vector<8x128xf32>
    %577 = arith.mulf %460, %549 : vector<8x128xf32>
    %578 = arith.mulf %466, %552 : vector<8x128xf32>
    %579 = arith.subf %577, %578 : vector<8x128xf32>
    %580 = arith.mulf %462, %552 : vector<8x128xf32>
    %581 = arith.mulf %468, %555 : vector<8x128xf32>
    %582 = arith.subf %580, %581 : vector<8x128xf32>
    %583 = arith.mulf %464, %555 : vector<8x128xf32>
    %584 = arith.mulf %470, %558 : vector<8x128xf32>
    %585 = arith.subf %583, %584 : vector<8x128xf32>
    %586 = arith.mulf %466, %558 : vector<8x128xf32>
    %587 = arith.mulf %472, %561 : vector<8x128xf32>
    %588 = arith.subf %586, %587 : vector<8x128xf32>
    %589 = arith.mulf %450, %564 : vector<8x128xf32>
    %590 = arith.mulf %458, %567 : vector<8x128xf32>
    %591 = arith.subf %589, %590 : vector<8x128xf32>
    %592 = arith.mulf %452, %567 : vector<8x128xf32>
    %593 = arith.mulf %460, %570 : vector<8x128xf32>
    %594 = arith.subf %592, %593 : vector<8x128xf32>
    %595 = arith.mulf %454, %570 : vector<8x128xf32>
    %596 = arith.mulf %462, %573 : vector<8x128xf32>
    %597 = arith.subf %595, %596 : vector<8x128xf32>
    %598 = arith.mulf %456, %573 : vector<8x128xf32>
    %599 = arith.mulf %464, %576 : vector<8x128xf32>
    %600 = arith.subf %598, %599 : vector<8x128xf32>
    %601 = arith.mulf %458, %576 : vector<8x128xf32>
    %602 = arith.mulf %466, %579 : vector<8x128xf32>
    %603 = arith.subf %601, %602 : vector<8x128xf32>
    %604 = arith.mulf %460, %579 : vector<8x128xf32>
    %605 = arith.mulf %468, %582 : vector<8x128xf32>
    %606 = arith.subf %604, %605 : vector<8x128xf32>
    %607 = arith.mulf %462, %582 : vector<8x128xf32>
    %608 = arith.mulf %470, %585 : vector<8x128xf32>
    %609 = arith.subf %607, %608 : vector<8x128xf32>
    %610 = arith.mulf %464, %585 : vector<8x128xf32>
    %611 = arith.mulf %472, %588 : vector<8x128xf32>
    %612 = arith.subf %610, %611 : vector<8x128xf32>
    %613 = vector.broadcast %20 : f32 to vector<8x128xf32>
    %614 = arith.mulf %613, %591 : vector<8x128xf32>
    %615 = vector.broadcast %21 : f32 to vector<8x128xf32>
    %616 = arith.mulf %615, %594 : vector<8x128xf32>
    %617 = arith.addf %614, %616 : vector<8x128xf32>
    %618 = vector.broadcast %22 : f32 to vector<8x128xf32>
    %619 = arith.mulf %618, %597 : vector<8x128xf32>
    %620 = vector.broadcast %23 : f32 to vector<8x128xf32>
    %621 = arith.mulf %620, %600 : vector<8x128xf32>
    %622 = arith.addf %619, %621 : vector<8x128xf32>
    %623 = arith.addf %617, %622 : vector<8x128xf32>
    %624 = vector.broadcast %24 : f32 to vector<8x128xf32>
    %625 = arith.mulf %624, %603 : vector<8x128xf32>
    %626 = vector.broadcast %25 : f32 to vector<8x128xf32>
    %627 = arith.mulf %626, %606 : vector<8x128xf32>
    %628 = arith.addf %625, %627 : vector<8x128xf32>
    %629 = vector.broadcast %26 : f32 to vector<8x128xf32>
    %630 = arith.mulf %629, %609 : vector<8x128xf32>
    %631 = vector.broadcast %27 : f32 to vector<8x128xf32>
    %632 = arith.mulf %631, %612 : vector<8x128xf32>
    %633 = arith.addf %630, %632 : vector<8x128xf32>
    %634 = arith.addf %628, %633 : vector<8x128xf32>
    %635 = arith.addf %623, %634 : vector<8x128xf32>
    %636 = arith.addf %448, %635 : vector<8x128xf32>
    %c3_141 = arith.constant 3 : index
    %637 = arith.index_cast %39 : i32 to index
    %c0_142 = arith.constant 0 : index
    %638 = vector.load %arg1[%c3_141, %637, %c0_142] : memref<4x8x128xf32, #tpu.memory_space<vmem>>, vector<1x8x128xf32>
    %639 = vector.shape_cast %638 : vector<1x8x128xf32> to vector<8x128xf32>
    %640 = arith.negf %639 : vector<8x128xf32>
    %641 = math.exp %640 : vector<8x128xf32>
    %cst_143 = arith.constant 1.000000e+00 : f32
    %642 = vector.broadcast %cst_143 : f32 to vector<8x128xf32>
    %643 = arith.addf %642, %641 : vector<8x128xf32>
    %644 = arith.divf %642, %643 : vector<8x128xf32>
    %645 = arith.mulf %639, %644 : vector<8x128xf32>
    %646 = vector.broadcast %3 : f32 to vector<8x128xf32>
    %647 = arith.mulf %646, %645 : vector<8x128xf32>
    %cst_144 = arith.constant -2.200000e+00 : f32
    %648 = vector.broadcast %cst_144 : f32 to vector<8x128xf32>
    %649 = arith.subf %639, %648 : vector<8x128xf32>
    %cst_145 = arith.constant -1.800000e+00 : f32
    %650 = vector.broadcast %cst_145 : f32 to vector<8x128xf32>
    %651 = arith.subf %639, %650 : vector<8x128xf32>
    %cst_146 = arith.constant -1.400000e+00 : f32
    %652 = vector.broadcast %cst_146 : f32 to vector<8x128xf32>
    %653 = arith.subf %639, %652 : vector<8x128xf32>
    %cst_147 = arith.constant -1.000000e+00 : f32
    %654 = vector.broadcast %cst_147 : f32 to vector<8x128xf32>
    %655 = arith.subf %639, %654 : vector<8x128xf32>
    %cst_148 = arith.constant -6.000000e-01 : f32
    %656 = vector.broadcast %cst_148 : f32 to vector<8x128xf32>
    %657 = arith.subf %639, %656 : vector<8x128xf32>
    %cst_149 = arith.constant -2.000000e-01 : f32
    %658 = vector.broadcast %cst_149 : f32 to vector<8x128xf32>
    %659 = arith.subf %639, %658 : vector<8x128xf32>
    %cst_150 = arith.constant 2.000000e-01 : f32
    %660 = vector.broadcast %cst_150 : f32 to vector<8x128xf32>
    %661 = arith.subf %639, %660 : vector<8x128xf32>
    %cst_151 = arith.constant 6.000000e-01 : f32
    %662 = vector.broadcast %cst_151 : f32 to vector<8x128xf32>
    %663 = arith.subf %639, %662 : vector<8x128xf32>
    %cst_152 = arith.constant 1.000000e+00 : f32
    %664 = vector.broadcast %cst_152 : f32 to vector<8x128xf32>
    %665 = arith.subf %639, %664 : vector<8x128xf32>
    %cst_153 = arith.constant 1.400000e+00 : f32
    %666 = vector.broadcast %cst_153 : f32 to vector<8x128xf32>
    %667 = arith.subf %639, %666 : vector<8x128xf32>
    %cst_154 = arith.constant 1.800000e+00 : f32
    %668 = vector.broadcast %cst_154 : f32 to vector<8x128xf32>
    %669 = arith.subf %639, %668 : vector<8x128xf32>
    %cst_155 = arith.constant 2.200000e+00 : f32
    %670 = vector.broadcast %cst_155 : f32 to vector<8x128xf32>
    %671 = arith.subf %639, %670 : vector<8x128xf32>
    %cst_156 = arith.constant -2.200000e+00 : f32
    %672 = vector.broadcast %cst_156 : f32 to vector<8x128xf32>
    %673 = arith.cmpf oge, %639, %672 : vector<8x128xf32>
    %674 = arith.extui %673 : vector<8x128xi1> to vector<8x128xi32>
    %675 = arith.sitofp %674 : vector<8x128xi32> to vector<8x128xf32>
    %cst_157 = arith.constant -1.800000e+00 : f32
    %676 = vector.broadcast %cst_157 : f32 to vector<8x128xf32>
    %677 = arith.cmpf oge, %639, %676 : vector<8x128xf32>
    %678 = arith.extui %677 : vector<8x128xi1> to vector<8x128xi32>
    %679 = arith.sitofp %678 : vector<8x128xi32> to vector<8x128xf32>
    %cst_158 = arith.constant -1.400000e+00 : f32
    %680 = vector.broadcast %cst_158 : f32 to vector<8x128xf32>
    %681 = arith.cmpf oge, %639, %680 : vector<8x128xf32>
    %682 = arith.extui %681 : vector<8x128xi1> to vector<8x128xi32>
    %683 = arith.sitofp %682 : vector<8x128xi32> to vector<8x128xf32>
    %cst_159 = arith.constant -1.000000e+00 : f32
    %684 = vector.broadcast %cst_159 : f32 to vector<8x128xf32>
    %685 = arith.cmpf oge, %639, %684 : vector<8x128xf32>
    %686 = arith.extui %685 : vector<8x128xi1> to vector<8x128xi32>
    %687 = arith.sitofp %686 : vector<8x128xi32> to vector<8x128xf32>
    %cst_160 = arith.constant -6.000000e-01 : f32
    %688 = vector.broadcast %cst_160 : f32 to vector<8x128xf32>
    %689 = arith.cmpf oge, %639, %688 : vector<8x128xf32>
    %690 = arith.extui %689 : vector<8x128xi1> to vector<8x128xi32>
    %691 = arith.sitofp %690 : vector<8x128xi32> to vector<8x128xf32>
    %cst_161 = arith.constant -2.000000e-01 : f32
    %692 = vector.broadcast %cst_161 : f32 to vector<8x128xf32>
    %693 = arith.cmpf oge, %639, %692 : vector<8x128xf32>
    %694 = arith.extui %693 : vector<8x128xi1> to vector<8x128xi32>
    %695 = arith.sitofp %694 : vector<8x128xi32> to vector<8x128xf32>
    %cst_162 = arith.constant 2.000000e-01 : f32
    %696 = vector.broadcast %cst_162 : f32 to vector<8x128xf32>
    %697 = arith.cmpf oge, %639, %696 : vector<8x128xf32>
    %698 = arith.extui %697 : vector<8x128xi1> to vector<8x128xi32>
    %699 = arith.sitofp %698 : vector<8x128xi32> to vector<8x128xf32>
    %cst_163 = arith.constant 6.000000e-01 : f32
    %700 = vector.broadcast %cst_163 : f32 to vector<8x128xf32>
    %701 = arith.cmpf oge, %639, %700 : vector<8x128xf32>
    %702 = arith.extui %701 : vector<8x128xi1> to vector<8x128xi32>
    %703 = arith.sitofp %702 : vector<8x128xi32> to vector<8x128xf32>
    %cst_164 = arith.constant 1.000000e+00 : f32
    %704 = vector.broadcast %cst_164 : f32 to vector<8x128xf32>
    %705 = arith.cmpf oge, %639, %704 : vector<8x128xf32>
    %706 = arith.extui %705 : vector<8x128xi1> to vector<8x128xi32>
    %707 = arith.sitofp %706 : vector<8x128xi32> to vector<8x128xf32>
    %cst_165 = arith.constant 1.400000e+00 : f32
    %708 = vector.broadcast %cst_165 : f32 to vector<8x128xf32>
    %709 = arith.cmpf oge, %639, %708 : vector<8x128xf32>
    %710 = arith.extui %709 : vector<8x128xi1> to vector<8x128xi32>
    %711 = arith.sitofp %710 : vector<8x128xi32> to vector<8x128xf32>
    %cst_166 = arith.constant 1.800000e+00 : f32
    %712 = vector.broadcast %cst_166 : f32 to vector<8x128xf32>
    %713 = arith.cmpf oge, %639, %712 : vector<8x128xf32>
    %714 = arith.extui %713 : vector<8x128xi1> to vector<8x128xi32>
    %715 = arith.sitofp %714 : vector<8x128xi32> to vector<8x128xf32>
    %cst_167 = arith.constant 2.200000e+00 : f32
    %716 = vector.broadcast %cst_167 : f32 to vector<8x128xf32>
    %717 = arith.cmpf oge, %639, %716 : vector<8x128xf32>
    %718 = arith.extui %717 : vector<8x128xi1> to vector<8x128xi32>
    %719 = arith.sitofp %718 : vector<8x128xi32> to vector<8x128xf32>
    %720 = arith.subf %675, %679 : vector<8x128xf32>
    %721 = arith.subf %679, %683 : vector<8x128xf32>
    %722 = arith.subf %683, %687 : vector<8x128xf32>
    %723 = arith.subf %687, %691 : vector<8x128xf32>
    %724 = arith.subf %691, %695 : vector<8x128xf32>
    %725 = arith.subf %695, %699 : vector<8x128xf32>
    %726 = arith.subf %699, %703 : vector<8x128xf32>
    %727 = arith.subf %703, %707 : vector<8x128xf32>
    %728 = arith.subf %707, %711 : vector<8x128xf32>
    %729 = arith.subf %711, %715 : vector<8x128xf32>
    %730 = arith.subf %715, %719 : vector<8x128xf32>
    %731 = arith.mulf %649, %720 : vector<8x128xf32>
    %732 = arith.mulf %653, %721 : vector<8x128xf32>
    %733 = arith.subf %731, %732 : vector<8x128xf32>
    %734 = arith.mulf %651, %721 : vector<8x128xf32>
    %735 = arith.mulf %655, %722 : vector<8x128xf32>
    %736 = arith.subf %734, %735 : vector<8x128xf32>
    %737 = arith.mulf %653, %722 : vector<8x128xf32>
    %738 = arith.mulf %657, %723 : vector<8x128xf32>
    %739 = arith.subf %737, %738 : vector<8x128xf32>
    %740 = arith.mulf %655, %723 : vector<8x128xf32>
    %741 = arith.mulf %659, %724 : vector<8x128xf32>
    %742 = arith.subf %740, %741 : vector<8x128xf32>
    %743 = arith.mulf %657, %724 : vector<8x128xf32>
    %744 = arith.mulf %661, %725 : vector<8x128xf32>
    %745 = arith.subf %743, %744 : vector<8x128xf32>
    %746 = arith.mulf %659, %725 : vector<8x128xf32>
    %747 = arith.mulf %663, %726 : vector<8x128xf32>
    %748 = arith.subf %746, %747 : vector<8x128xf32>
    %749 = arith.mulf %661, %726 : vector<8x128xf32>
    %750 = arith.mulf %665, %727 : vector<8x128xf32>
    %751 = arith.subf %749, %750 : vector<8x128xf32>
    %752 = arith.mulf %663, %727 : vector<8x128xf32>
    %753 = arith.mulf %667, %728 : vector<8x128xf32>
    %754 = arith.subf %752, %753 : vector<8x128xf32>
    %755 = arith.mulf %665, %728 : vector<8x128xf32>
    %756 = arith.mulf %669, %729 : vector<8x128xf32>
    %757 = arith.subf %755, %756 : vector<8x128xf32>
    %758 = arith.mulf %667, %729 : vector<8x128xf32>
    %759 = arith.mulf %671, %730 : vector<8x128xf32>
    %760 = arith.subf %758, %759 : vector<8x128xf32>
    %761 = arith.mulf %649, %733 : vector<8x128xf32>
    %762 = arith.mulf %655, %736 : vector<8x128xf32>
    %763 = arith.subf %761, %762 : vector<8x128xf32>
    %764 = arith.mulf %651, %736 : vector<8x128xf32>
    %765 = arith.mulf %657, %739 : vector<8x128xf32>
    %766 = arith.subf %764, %765 : vector<8x128xf32>
    %767 = arith.mulf %653, %739 : vector<8x128xf32>
    %768 = arith.mulf %659, %742 : vector<8x128xf32>
    %769 = arith.subf %767, %768 : vector<8x128xf32>
    %770 = arith.mulf %655, %742 : vector<8x128xf32>
    %771 = arith.mulf %661, %745 : vector<8x128xf32>
    %772 = arith.subf %770, %771 : vector<8x128xf32>
    %773 = arith.mulf %657, %745 : vector<8x128xf32>
    %774 = arith.mulf %663, %748 : vector<8x128xf32>
    %775 = arith.subf %773, %774 : vector<8x128xf32>
    %776 = arith.mulf %659, %748 : vector<8x128xf32>
    %777 = arith.mulf %665, %751 : vector<8x128xf32>
    %778 = arith.subf %776, %777 : vector<8x128xf32>
    %779 = arith.mulf %661, %751 : vector<8x128xf32>
    %780 = arith.mulf %667, %754 : vector<8x128xf32>
    %781 = arith.subf %779, %780 : vector<8x128xf32>
    %782 = arith.mulf %663, %754 : vector<8x128xf32>
    %783 = arith.mulf %669, %757 : vector<8x128xf32>
    %784 = arith.subf %782, %783 : vector<8x128xf32>
    %785 = arith.mulf %665, %757 : vector<8x128xf32>
    %786 = arith.mulf %671, %760 : vector<8x128xf32>
    %787 = arith.subf %785, %786 : vector<8x128xf32>
    %788 = arith.mulf %649, %763 : vector<8x128xf32>
    %789 = arith.mulf %657, %766 : vector<8x128xf32>
    %790 = arith.subf %788, %789 : vector<8x128xf32>
    %791 = arith.mulf %651, %766 : vector<8x128xf32>
    %792 = arith.mulf %659, %769 : vector<8x128xf32>
    %793 = arith.subf %791, %792 : vector<8x128xf32>
    %794 = arith.mulf %653, %769 : vector<8x128xf32>
    %795 = arith.mulf %661, %772 : vector<8x128xf32>
    %796 = arith.subf %794, %795 : vector<8x128xf32>
    %797 = arith.mulf %655, %772 : vector<8x128xf32>
    %798 = arith.mulf %663, %775 : vector<8x128xf32>
    %799 = arith.subf %797, %798 : vector<8x128xf32>
    %800 = arith.mulf %657, %775 : vector<8x128xf32>
    %801 = arith.mulf %665, %778 : vector<8x128xf32>
    %802 = arith.subf %800, %801 : vector<8x128xf32>
    %803 = arith.mulf %659, %778 : vector<8x128xf32>
    %804 = arith.mulf %667, %781 : vector<8x128xf32>
    %805 = arith.subf %803, %804 : vector<8x128xf32>
    %806 = arith.mulf %661, %781 : vector<8x128xf32>
    %807 = arith.mulf %669, %784 : vector<8x128xf32>
    %808 = arith.subf %806, %807 : vector<8x128xf32>
    %809 = arith.mulf %663, %784 : vector<8x128xf32>
    %810 = arith.mulf %671, %787 : vector<8x128xf32>
    %811 = arith.subf %809, %810 : vector<8x128xf32>
    %812 = vector.broadcast %28 : f32 to vector<8x128xf32>
    %813 = arith.mulf %812, %790 : vector<8x128xf32>
    %814 = vector.broadcast %29 : f32 to vector<8x128xf32>
    %815 = arith.mulf %814, %793 : vector<8x128xf32>
    %816 = arith.addf %813, %815 : vector<8x128xf32>
    %817 = vector.broadcast %30 : f32 to vector<8x128xf32>
    %818 = arith.mulf %817, %796 : vector<8x128xf32>
    %819 = vector.broadcast %31 : f32 to vector<8x128xf32>
    %820 = arith.mulf %819, %799 : vector<8x128xf32>
    %821 = arith.addf %818, %820 : vector<8x128xf32>
    %822 = arith.addf %816, %821 : vector<8x128xf32>
    %823 = vector.broadcast %32 : f32 to vector<8x128xf32>
    %824 = arith.mulf %823, %802 : vector<8x128xf32>
    %825 = vector.broadcast %33 : f32 to vector<8x128xf32>
    %826 = arith.mulf %825, %805 : vector<8x128xf32>
    %827 = arith.addf %824, %826 : vector<8x128xf32>
    %828 = vector.broadcast %34 : f32 to vector<8x128xf32>
    %829 = arith.mulf %828, %808 : vector<8x128xf32>
    %830 = vector.broadcast %35 : f32 to vector<8x128xf32>
    %831 = arith.mulf %830, %811 : vector<8x128xf32>
    %832 = arith.addf %829, %831 : vector<8x128xf32>
    %833 = arith.addf %827, %832 : vector<8x128xf32>
    %834 = arith.addf %822, %833 : vector<8x128xf32>
    %835 = arith.addf %647, %834 : vector<8x128xf32>
    %836 = arith.addf %238, %437 : vector<8x128xf32>
    %837 = arith.addf %636, %835 : vector<8x128xf32>
    %838 = arith.addf %836, %837 : vector<8x128xf32>
    %839 = arith.index_cast %39 : i32 to index
    %c0_168 = arith.constant 0 : index
    %840 = vector.load %arg4[%839, %c0_168] : memref<8x128xf32, #tpu.memory_space<vmem>>, vector<8x128xf32>
    tpu.vector_store %arg4[%839, %c0_168], %838 {strides = array<i32>} : memref<8x128xf32, #tpu.memory_space<vmem>>, vector<8x128xf32>,
    %c1_i32_169 = arith.constant 1 : i32
    return
  }
  func.func @transform_0(%arg0: i32) -> (i32, i32, i32) {
    %c0_i32 = arith.constant 0 : i32
    %c0_i32_0 = arith.constant 0 : i32
    %c0_i32_1 = arith.constant 0 : i32
    return %c0_i32, %arg0, %c0_i32_0 : i32, i32, i32
  }
  func.func @transform_1(%arg0: i32) -> i32 {
    %c0_i32 = arith.constant 0 : i32
    %c0_i32_0 = arith.constant 0 : i32
    return %c0_i32 : i32
  }
  func.func @transform_2(%arg0: i32) -> (i32, i32) {
    %c0_i32 = arith.constant 0 : i32
    %c0_i32_0 = arith.constant 0 : i32
    %c0_i32_1 = arith.constant 0 : i32
    return %c0_i32, %c0_i32_0 : i32, i32
  }
  func.func @transform_3(%arg0: i32) -> (i32, i32) {
    %c0_i32 = arith.constant 0 : i32
    %c0_i32_0 = arith.constant 0 : i32
    return %arg0, %c0_i32 : i32, i32
  }
}

</mosaic_0001>

<bundles_post_ra>
// kernel: kan_convolution_forward.1
= control target key start
LH: loop header
LB: loop body
LE: loop exit
PB: predicated region body
PF: predicated region fallthrough
CT: control target
= control target key end

     0   :  { %8 = vsyncpa [#allocation4], 0  ;;  %s2142_s0 = inlined_call_operand.vmem [shape: f32[4,16,128], index: 0, kind: input, shape index: {}]   ;;  %s2143_s1 = inlined_call_operand.vmem [shape: f32[4], index: 1, kind: input, shape index: {}]   ;;  %s2144_s2 = inlined_call_operand.vmem [shape: f32[4,8], index: 2, kind: input, shape index: {}]   ;;  %s2145_s3 = inlined_call_operand.vmem [shape: f32[16,128], index: 3, kind: output, shape index: {}]  }
   0x1   :  { %9 = vsyncpa [#allocation6], 0  ;;  %s1367_s12 = smov 0   ;;  %s1369_s13 = smov 0  }
   0x2   :  { %s1371_s14 = smov 0  }
   0x3 LB: > { %s1383_s15 = sadd.s32 4294967295, %s1342_s14   ;;  %s1386_s16 = sadd.s32 1, %s1342_s14   ;;  %s1342_s14 = sphi %s1371_s14, %s2159_s14   ;;  %s1338_s13 = sphi %s1369_s13, %s2158_s13   ;;  %s1334_s12 = sphi %s1367_s12, %s2157_s12  }
   0x4   : > { %s19_s17 = ssub.s32 %s1342_s14, %s1386_s16  ;;  %s22_s18 = sadd.s32 1, %s1338_s13 }
   0x5   : > { %p20_p0 = scmp.eq.s32.totalorder %s19_s17, 0  ;;  %p29_p1 = scmp.ne.s32.totalorder %s1338_s13, %s1334_s12 }
   0x6   : > { %p30_p2 = scmp.eq.s32.totalorder %s1342_s14, 0  ;;  %p1070_p3 = scmp.ge.s32.totalorder %s1342_s14, 1 }
   0x7   : > { %s1396_s19 = scalar_select %p20_p0, %s1338_s13, %s22_s18  }
   0x8   : > { %p1398_p4 = por %p30_p2, %p29_p1  ;;  %p114_p5 = scmp.lt.s32.totalorder %s1342_s14, 3 }
   0x9   : > { %p2146_p6 = scmp.eq.s32.totalorder %s1383_s15, 0  ;;  %s127_s24 = sshll.u32 %s2143_s1, 4  ;;  %s128_s24 = int_to_ptr.vmem [resolvable:$true] %s127_s24 }
   0xa   : > { %s2148_s20 = scalar_select %p1398_p4, 1, 0 }
   0xb   : > { %p1404_p7 = pnand %p1070_p3, %p114_p5  ;;  %s138_s27 = sshll.u32 %s2144_s2, 4  ;;  %s139_s27 = int_to_ptr.vmem [resolvable:$true] %s138_s27 }
   0xc   : > { %s1282_s29 = scalar_lea.vmem %s128_s24, 16  ;;  %p1290_p0 = scmp.lt.s32.totalorder %s128_s24, %s128_s24 }
   0xd   : > { %s2149_s21 = scalar_select %p1404_p7, 1, 0 }
   0xe   : > { %p1228_p8 = pneg %p1404_p7  ;;  %p1283_p10 = scmp.ne.s32.totalorder %s128_s24, %s1282_s29 }
   0xf   : > { %p1291_p1 = scmp.lt.s32.totalorder %s1282_s29, %s1282_s29 }
  0x10   : > { %p1418_p9 = pnand %p2146_p6, %p1228_p8 }
  0x11   : > { %p1292_p2 = por %p1291_p1, %p1290_p0 }
  0x12   : > { %p1284_p11 = pneg %p1418_p9 }
  0x14   : > { %p1285_p12 = pnand %p1284_p11, %p1283_p10 }
  0x16   : > { %p1286_p13 = pneg %p1285_p12 }
  0x18   : > { %p1293_p3 = pnand %p1292_p2, %p1286_p13 }
  0x1a   : > { %1296 = shalt.err (!%p1293_p3)
}
  0x1b   : > { %s1344_s30 = smov [#allocation3]   ;;  %s1297_s4 = scalar_lea.vmem %s139_s27, 64 }
  0x1c   : > { %1231 = dma.vmem_to_smem (!%p1418_p9), %s128_s24, 16, %s1344_s30, [#allocation4]  }
  0x1d   : > { %p1298_p5 = scmp.ne.s32.totalorder %s139_s27, %s1297_s4  ;;  %p1305_p7 = scmp.lt.s32.totalorder %s139_s27, %s139_s27 }
  0x1e   : > { %p1306_p4 = scmp.lt.s32.totalorder %s1297_s4, %s1297_s4 }
  0x1f   : > { %p1300_p8 = pnand %p1298_p5, %p1284_p11 }
  0x20   : > { %p1307_p10 = por %p1306_p4, %p1305_p7 }
  0x21   : > { %p1301_p6 = pneg %p1300_p8 }
  0x23   : > { %p1308_p12 = pnand %p1307_p10, %p1301_p6 }
  0x25   : > { %1311 = shalt.err (!%p1308_p12)
}
  0x26   : > { %s1345_s5 = smov [#allocation5]   ;;  %p1073_p13 = scmp.ge.s32.totalorder %s1342_s14, 2 }
  0x27   : > { %1234 = dma.vmem_to_smem (!%p1418_p9), %s139_s27, 64, %s1345_s5, [#allocation6]  }
  0x28   : > { %145 = sbr.rel (%p1073_p13) target bundleno = 54 (0x36), region = 24  ;;  %p2151_p0 = scmp.ne.s32.totalorder (!%p1073_p13), %s2148_s20, 0 }
  0x2f   : > { %148 = sbr.rel (!%p2151_p0) target bundleno = 54 (0x36), region = 28  ;;  %s150_s6 = sand.u32 (%p2151_p0), 1, %s1338_s13  }
  0x30   : > { %s1075_s7 = sshll.u32 (%p2151_p0), %s1342_s14, 3  ;;  %s1074_s8 = sshll.u32 (%p2151_p0), %s150_s6, 5 }
  0x31   : > { %s154_s11 = scalar_lea.vmem (%p2151_p0), %s2142_s0, %s1075_s7  ;;  %s152_s17 = scalar_lea.vmem (%p2151_p0), [#allocation2], %s1074_s8 }
  0x32   : > { %v188_v0 = vld [vmem:[%s154_s11] sm:$0xff] (%p2151_p0)  ;;  %v190_v1 = vld [vmem:[%s154_s11 + $0x10] sm:$0xff] (%p2151_p0) }
  0x33   : > { %v192_v2 = vld [vmem:[%s154_s11 + $0x20] sm:$0xff] (%p2151_p0)  ;;  %189 = vst [vmem:[%s152_s17] sm:$0xff] (%p2151_p0), %v188_v0  ;;  %191 = vst [vmem:[%s152_s17 + $0x8] sm:$0xff] (%p2151_p0), %v190_v1  ;;  %v194_v3 = vld [vmem:[%s154_s11 + $0x30] sm:$0xff] (%p2151_p0) }
  0x34   : > { %193 = vst [vmem:[%s152_s17 + $0x10] sm:$0xff] (%p2151_p0), %v192_v2  ;;  %195 = vst [vmem:[%s152_s17 + $0x18] sm:$0xff] (%p2151_p0), %v194_v3 }
  0x36 PF: > { %p2152_p4 = scmp.ne.s32.totalorder %s2149_s21, 0 }
  0x37   : > { %s207_s14 = sand.u32 (!%p2152_p4), 1, %s1334_s12   ;;  %p2153_p6 = scmp.eq.s32.totalorder (!%p2152_p4), %s1383_s15, 0 }
  0x38   : > { %204 = sbr.rel (%p2152_p4) target bundleno = 243 (0xf3), region = 66  ;;  %s1077_s18 = sshll.u32 (!%p2152_p4), %s207_s14, 5 }
  0x39   : > { %s1439_s20 = scalar_lea.vmem (!%p2152_p4), [#allocation2], %s1077_s18 }
  0x3f   : > { %1325 = dma.done.wait (%p2153_p6), [#allocation4], 16   ;;  %p2154_p7 = pmov %p2153_p6 }
  0x40   : > { %p2155_p9 = pmov %p2153_p6 }
  0x41   : > { %1327 = vsyncadd (%p2154_p7), [#allocation4], 4294967280 }
  0x42   : > { %1329 = dma.done.wait (%p2155_p9), [#allocation6], 64   ;;  %p2156_p11 = pmov %p2153_p6 }
  0x44   : > { %1331 = vsyncadd (%p2156_p11), [#allocation6], 4294967232 }
  0x45   : > { %221 = sfence }
  0x46   : > { %v1450_v4 = vld [vmem:[%s1439_s20] sm:$0xff]  ;;  %s1453_s12 = sld [smem:[#allocation3]]  ;;  %s1455_s21 = sld [smem:[#allocation3 + $0x1]]  ;;  %v1346_v17 = vmov 0.0  }
  0x47   : > { %v1115_v5 = vmul.f32 -1.442695, %v1450_v4  ;;  %s1457_s22 = sld [smem:[#allocation3 + $0x2]]  ;;  %s1459_s23 = sld [smem:[#allocation5]]  ;;  %v1464_v6 = vadd.f32 2.2, %v1450_v4 }
  0x48   : > { %s1461_s24 = sld [smem:[#allocation5 + $0x1]]  ;;  %s1466_s25 = sld [smem:[#allocation5 + $0x2]]  ;;  %v1471_v7 = vadd.f32 1.8, %v1450_v4  ;;  %v1476_v8 = vadd.f32 1.4, %v1450_v4 }
  0x49   : > { %1266 = vpow2.f32 %v1115_v5  ;;  %s1468_s26 = sld [smem:[#allocation5 + $0x3]]  ;;  %s1473_s27 = sld [smem:[#allocation5 + $0x4]]  ;;  %v1479_v9 = vadd.f32 0.6, %v1450_v4  ;;  %v1486_v10 = vadd.f32 1.0, %v1450_v4  ;;  %v1489_v11 = vadd.f32 -1.0, %v1450_v4 }
  0x4a   : > { %s1481_s28 = sld [smem:[#allocation5 + $0x5]]  ;;  %s1483_s29 = sld [smem:[#allocation5 + $0x6]]  ;;  %v1494_v12 = vadd.f32 0.2, %v1450_v4  ;;  %v1497_v13 = vadd.f32 -0.2, %v1450_v4 }
  0x4b   : > { %s1491_s30 = sld [smem:[#allocation5 + $0x7]]  ;;  %s1499_s4 = sld [smem:[#allocation5 + $0x80]]  ;;  %vm300_vm0 = vcmp.ge.f32.partialorder %v1450_v4, -2.2  ;;  %v1506_v15 = vadd.f32 -0.6, %v1450_v4 }
  0x4c   : > { %s1501_s5 = sld [smem:[#allocation5 + $0x81]]  ;;  %v286_v14 = vstv %s1453_s12  ;;  %v1509_v16 = vadd.f32 -1.4, %v1450_v4  ;;  %vm309_vm1 = vcmp.ge.f32.partialorder %v1450_v4, -1.0  ;;  %v1128_v18 = vsel %vm300_vm0, 1.0, %v1346_v17  ;;  %s1583_s6 = sld [smem:[#allocation5 + $0x82]] }
  0x4d   : > { %vm303_vm2 = vcmp.ge.f32.partialorder %v1450_v4, -1.8  ;;  %v462_v19 = vstv %s1455_s21  ;;  %v638_v20 = vstv %s1457_s22  ;;  %v1517_v22 = vadd.f32 -1.8, %v1450_v4  ;;  %s1593_s7 = sld [smem:[#allocation5 + $0x83]]  ;;  %s1597_s8 = sld [smem:[#allocation5 + $0x84]] }
  0x4e   : > { %v1520_v23 = vadd.f32 -2.2, %v1450_v4  ;;  %v1129_v24 = vsel %vm303_vm2, 1.0, %v1346_v17  ;;  %v428_v25 = vstv %s1459_s23  ;;  %v1131_v26 = vsel %vm309_vm1, 1.0, %v1346_v17  ;;  %s1602_s9 = sld [smem:[#allocation5 + $0x85]]  ;;  %s1747_s10 = sld [smem:[#allocation5 + $0x86]] }
  0x4f   : > { %v430_v27 = vstv %s1461_s24  ;;  %v433_v28 = vstv %s1466_s25  ;;  %v435_v29 = vstv %s1468_s26  ;;  %vm306_vm3 = vcmp.ge.f32.partialorder %v1450_v4, -1.4  ;;  %s1749_s11 = sld [smem:[#allocation5 + $0x87]]  ;;  %s1767_s17 = sld [smem:[#allocation5 + $0x100]] }
  0x50   : > { %vm324_vm4 = vcmp.ge.f32.partialorder %v1450_v4, 1.0  ;;  %v336_v30 = vsub.f32 %v1128_v18, %v1129_v24  ;;  %v439_v31 = vstv %s1473_s27  ;;  %v1130_v33 = vsel %vm306_vm3, 1.0, %v1346_v17  ;;  %s1800_s14 = sld [smem:[#allocation5 + $0x101]]  ;;  %s1905_s18 = sld [smem:[#allocation5 + $0x102]] }
  0x51   : > { %v441_v34 = vstv %s1481_s28  ;;  %v444_v35 = vstv %s1483_s29  ;;  %vm312_vm5 = vcmp.ge.f32.partialorder %v1450_v4, -0.6  ;;  %v337_v36 = vsub.f32 %v1129_v24, %v1130_v33  ;;  %s1907_s12 = sld [smem:[#allocation5 + $0x103]]  ;;  %s1911_s23 = sld [smem:[#allocation5 + $0x104]] }
  0x52   : > { %v338_v37 = vsub.f32 %v1130_v33, %v1131_v26  ;;  %v446_v38 = vstv %s1491_s30  ;;  %v1132_v39 = vsel %vm312_vm5, 1.0, %v1346_v17  ;;  %v1136_v40 = vsel %vm324_vm4, 1.0, %v1346_v17  ;;  %s1916_s24 = sld [smem:[#allocation5 + $0x105]]  ;;  %s1918_s25 = sld [smem:[#allocation5 + $0x106]] }
  0x53   : > { %v1267_v21 = vpop.eup %1266  ;;  %v604_v41 = vstv %s1499_s4  ;;  %v606_v42 = vstv %s1501_s5  ;;  %vm315_vm6 = vcmp.ge.f32.partialorder %v1450_v4, -0.2  ;;  %v339_v43 = vsub.f32 %v1131_v26, %v1132_v39  ;;  %s1923_s26 = sld [smem:[#allocation5 + $0x107]]  ;;  %s1939_s27 = sld [smem:[#allocation5 + $0x180]] }
  0x54   : > { %v282_v32 = vadd.f32 1.0, %v1267_v21  ;;  %v347_v44 = vmul.f32 %v1464_v6, %v336_v30  ;;  %v348_v45 = vmul.f32 %v1476_v8, %v337_v36  ;;  %v1133_v46 = vsel %vm315_vm6, 1.0, %v1346_v17  ;;  %s2072_s21 = sld [smem:[#allocation5 + $0x182]]  ;;  %s2077_s28 = sld [smem:[#allocation5 + $0x183]] }
  0x55   : > { %vm318_vm7 = vcmp.ge.f32.partialorder %v1450_v4, 0.2  ;;  %v350_v47 = vmul.f32 %v1471_v7, %v337_v36  ;;  %v351_v48 = vmul.f32 %v1486_v10, %v338_v37  ;;  %vm321_vm8 = vcmp.ge.f32.partialorder %v1450_v4, 0.6  ;;  %s2079_s29 = sld [smem:[#allocation5 + $0x184]]  ;;  %s2083_s30 = sld [smem:[#allocation5 + $0x185]] }
  0x56   : > { %v1134_v49 = vsel %vm318_vm7, 1.0, %v1346_v17  ;;  %vm327_vm9 = vcmp.ge.f32.partialorder %v1450_v4, 1.4  ;;  %v340_v50 = vsub.f32 %v1132_v39, %v1133_v46  ;;  %v1135_v51 = vsel %vm321_vm8, 1.0, %v1346_v17  ;;  %s2088_s4 = sld [smem:[#allocation5 + $0x186]]  ;;  %s2090_s5 = sld [smem:[#allocation5 + $0x187]] }
  0x57   : > { %v1137_v52 = vsel %vm327_vm9, 1.0, %v1346_v17  ;;  %vm330_vm10 = vcmp.ge.f32.partialorder %v1450_v4, 1.8  ;;  %vm333_vm11 = vcmp.ge.f32.partialorder %v1450_v4, 2.2  ;;  %v341_v55 = vsub.f32 %v1133_v46, %v1134_v49  ;;  %p238_p1 = scmp.lt.s32.totalorder %s1383_s15, 1 }
  0x58   : > { %v1138_v53 = vsel %vm330_vm10, 1.0, %v1346_v17  ;;  %v1139_v54 = vsel %vm333_vm11, 1.0, %v1346_v17  ;;  %v342_v56 = vsub.f32 %v1134_v49, %v1135_v51  ;;  %1268 = vrcp.f32 %v282_v32 }
  0x59   : > { %v343_v57 = vsub.f32 %v1135_v51, %v1136_v40  ;;  %v344_v58 = vsub.f32 %v1136_v40, %v1137_v52  ;;  %v353_v59 = vmul.f32 %v1476_v8, %v338_v37  ;;  %v345_v60 = vsub.f32 %v1137_v52, %v1138_v53  ;;  %s2161_s15 = smov (!%p238_p1, %s1383_s15), 1 }
  0x5a   : > { %v346_v61 = vsub.f32 %v1138_v53, %v1139_v54  ;;  %v354_v62 = vmul.f32 %v1479_v9, %v339_v43  ;;  %v356_v63 = vmul.f32 %v1486_v10, %v339_v43  ;;  %v357_v0 = vmul.f32 %v1494_v12, %v340_v50  ;;  %s1080_s22 = sshll.u32 %s2161_s15, 3 }
  0x5b   : > { %v359_v1 = vmul.f32 %v1479_v9, %v340_v50  ;;  %v360_v2 = vmul.f32 %v1497_v13, %v341_v55  ;;  %v362_v3 = vmul.f32 %v1494_v12, %v341_v55  ;;  %v349_v5 = vsub.f32 %v347_v44, %v348_v45 }
  0x5c   : > { %v352_v18 = vsub.f32 %v350_v47, %v351_v48  ;;  %v363_v21 = vmul.f32 %v1506_v15, %v342_v56  ;;  %v365_v24 = vmul.f32 %v1497_v13, %v342_v56  ;;  %v355_v26 = vsub.f32 %v353_v59, %v354_v62 }
  0x5d   : > { %v358_v30 = vsub.f32 %v356_v63, %v357_v0  ;;  %v366_v32 = vmul.f32 %v1489_v11, %v343_v57  ;;  %v368_v33 = vmul.f32 %v1506_v15, %v343_v57  ;;  %v361_v36 = vsub.f32 %v359_v1, %v360_v2 }
  0x5e   : > { %v364_v37 = vsub.f32 %v362_v3, %v363_v21  ;;  %v369_v39 = vmul.f32 %v1509_v16, %v344_v58  ;;  %v371_v40 = vmul.f32 %v1489_v11, %v344_v58  ;;  %v372_v44 = vmul.f32 %v1517_v22, %v345_v60 }
  0x5f   : > { %v367_v43 = vsub.f32 %v365_v24, %v366_v32  ;;  %v374_v45 = vmul.f32 %v1509_v16, %v345_v60  ;;  %v375_v46 = vmul.f32 %v1520_v23, %v346_v61  ;;  %v377_v48 = vmul.f32 %v1464_v6, %v349_v5 }
  0x60   : > { %v370_v47 = vsub.f32 %v368_v33, %v369_v39  ;;  %v378_v49 = vmul.f32 %v1486_v10, %v352_v18  ;;  %v380_v50 = vmul.f32 %v1471_v7, %v352_v18  ;;  %v373_v51 = vsub.f32 %v371_v40, %v372_v44 }
  0x61   : > { %v376_v52 = vsub.f32 %v374_v45, %v375_v46  ;;  %v381_v53 = vmul.f32 %v1479_v9, %v355_v26  ;;  %v383_v54 = vmul.f32 %v1476_v8, %v355_v26  ;;  %v384_v56 = vmul.f32 %v1494_v12, %v358_v30 }
  0x62   : > { %v379_v55 = vsub.f32 %v377_v48, %v378_v49  ;;  %v386_v57 = vmul.f32 %v1486_v10, %v358_v30  ;;  %v387_v58 = vmul.f32 %v1497_v13, %v361_v36  ;;  %v1269_v59 = vpop.eup %1268  ;;  %v389_v61 = vmul.f32 %v1479_v9, %v361_v36 }
  0x63   : > { %v382_v60 = vsub.f32 %v380_v50, %v381_v53  ;;  %v390_v62 = vmul.f32 %v1506_v15, %v364_v37  ;;  %v392_v63 = vmul.f32 %v1494_v12, %v364_v37  ;;  %v385_v0 = vsub.f32 %v383_v54, %v384_v56 }
  0x64   : > { %v388_v1 = vsub.f32 %v386_v57, %v387_v58  ;;  %v393_v2 = vmul.f32 %v1489_v11, %v367_v43  ;;  %v395_v3 = vmul.f32 %v1497_v13, %v367_v43  ;;  %v396_v18 = vmul.f32 %v1509_v16, %v370_v47 }
  0x65   : > { %v391_v5 = vsub.f32 %v389_v61, %v390_v62  ;;  %v398_v21 = vmul.f32 %v1506_v15, %v370_v47  ;;  %v399_v24 = vmul.f32 %v1517_v22, %v373_v51  ;;  %v401_v30 = vmul.f32 %v1489_v11, %v373_v51 }
  0x66   : > { %v394_v26 = vsub.f32 %v392_v63, %v393_v2  ;;  %v402_v32 = vmul.f32 %v1520_v23, %v376_v52  ;;  %v404_v33 = vmul.f32 %v1464_v6, %v379_v55  ;;  %v397_v36 = vsub.f32 %v395_v3, %v396_v18 }
  0x67   : > { %v400_v37 = vsub.f32 %v398_v21, %v399_v24  ;;  %v405_v39 = vmul.f32 %v1479_v9, %v382_v60  ;;  %v407_v40 = vmul.f32 %v1471_v7, %v382_v60  ;;  %v408_v44 = vmul.f32 %v1494_v12, %v385_v0 }
  0x68   : > { %v403_v43 = vsub.f32 %v401_v30, %v402_v32  ;;  %v410_v45 = vmul.f32 %v1476_v8, %v385_v0  ;;  %v411_v46 = vmul.f32 %v1497_v13, %v388_v1  ;;  %v413_v47 = vmul.f32 %v1486_v10, %v388_v1 }
  0x69   : > { %v406_v6 = vsub.f32 %v404_v33, %v405_v39  ;;  %v414_v48 = vmul.f32 %v1506_v15, %v391_v5  ;;  %v416_v7 = vmul.f32 %v1479_v9, %v391_v5  ;;  %v409_v49 = vsub.f32 %v407_v40, %v408_v44  ;;  %v1613_v9 = vld [vmem:[%s1439_s20 + $0x8] sm:$0xff] }
  0x6a   : > { %v412_v50 = vsub.f32 %v410_v45, %v411_v46  ;;  %v417_v51 = vmul.f32 %v1489_v11, %v394_v26  ;;  %v419_v8 = vmul.f32 %v1494_v12, %v394_v26  ;;  %v420_v53 = vmul.f32 %v1509_v16, %v397_v36 }
  0x6b   : > { %v415_v52 = vsub.f32 %v413_v47, %v414_v48  ;;  %v422_v10 = vmul.f32 %v1497_v13, %v397_v36  ;;  %v423_v54 = vmul.f32 %v1517_v22, %v400_v37  ;;  %v425_v11 = vmul.f32 %v1506_v15, %v400_v37 }
  0x6c   : > { %v418_v55 = vsub.f32 %v416_v7, %v417_v51  ;;  %v426_v12 = vmul.f32 %v1520_v23, %v403_v43  ;;  %v609_v56 = vstv %s1583_s6  ;;  %v421_v57 = vsub.f32 %v419_v8, %v420_v53  ;;  %s2097_s6 = sld [smem:[#allocation3 + $0x3]] }
  0x6d   : > { %v424_v16 = vsub.f32 %v422_v10, %v423_v54  ;;  %v429_v58 = vmul.f32 %v428_v25, %v406_v6  ;;  %v431_v13 = vmul.f32 %v430_v27, %v409_v49  ;;  %v434_v60 = vmul.f32 %v433_v28, %v412_v50 }
  0x6e   : > { %v427_v22 = vsub.f32 %v425_v11, %v426_v12  ;;  %v436_v61 = vmul.f32 %v435_v29, %v415_v52  ;;  %v1141_v62 = vmul.f32 -1.442695, %v1613_v9  ;;  %v440_v15 = vmul.f32 %v439_v31, %v418_v55 }
  0x6f   : > { %v442_v23 = vmul.f32 %v441_v34, %v421_v57  ;;  %v1632_v63 = vadd.f32 1.0, %v1613_v9  ;;  %v611_v0 = vstv %s1593_s7  ;;  %v445_v25 = vmul.f32 %v444_v35, %v424_v16 }
  0x70   : > { %v447_v27 = vmul.f32 %v446_v38, %v427_v22  ;;  %1270 = vpow2.f32 %v1141_v62  ;;  %v615_v1 = vstv %s1597_s8  ;;  %v1641_v28 = vmul.f32 %v1269_v59, %v1450_v4 }
  0x71   : > { %v1643_v29 = vadd.f32 %v431_v13, %v429_v58  ;;  %v1646_v2 = vadd.f32 2.2, %v1613_v9  ;;  %v617_v31 = vstv %s1602_s9  ;;  %v1649_v34 = vadd.f32 %v436_v61, %v434_v60  ;;  %s241_s9 = scalar_lea.vmem %s2145_s3, %s1080_s22 }
  0x72   : > { %v1652_v3 = vadd.f32 1.8, %v1613_v9  ;;  %v1655_v35 = vadd.f32 1.4, %v1613_v9  ;;  %v1658_v38 = vadd.f32 0.6, %v1613_v9  ;;  %v1660_v5 = vadd.f32 %v442_v23, %v440_v15 }
  0x73   : > { %v1663_v4 = vadd.f32 0.2, %v1613_v9  ;;  %v1666_v59 = vadd.f32 -0.2, %v1613_v9  ;;  %vm485_vm12 = vcmp.ge.f32.partialorder %v1613_v9, -1.0  ;;  %v1669_v18 = vadd.f32 %v447_v27, %v445_v25 }
  0x74   : > { %v1672_v21 = vadd.f32 -0.6, %v1613_v9  ;;  %vm476_vm13 = vcmp.ge.f32.partialorder %v1613_v9, -2.2  ;;  %vm479_vm14 = vcmp.ge.f32.partialorder %v1613_v9, -1.8 }
  0x75   : > { %v1677_v24 = vadd.f32 -1.0, %v1613_v9  ;;  %v1680_v26 = vadd.f32 -1.4, %v1613_v9  ;;  %v1154_v30 = vsel %vm476_vm13, 1.0, %v1346_v17  ;;  %vm482_vm15 = vcmp.ge.f32.partialorder %v1613_v9, -1.4 }
  0x76   : > { %v1155_v32 = vsel %vm479_vm14, 1.0, %v1346_v17  ;;  %v1157_v33 = vsel %vm485_vm12, 1.0, %v1346_v17  ;;  %vm488_vm0 = vcmp.ge.f32.partialorder %v1613_v9, -0.6  ;;  %vm491_vm1 = vcmp.ge.f32.partialorder %v1613_v9, -0.2 }
  0x77   : > { %v1156_v36 = vsel %vm482_vm15, 1.0, %v1346_v17  ;;  %v1158_v37 = vsel %vm488_vm0, 1.0, %v1346_v17  ;;  %vm494_vm2 = vcmp.ge.f32.partialorder %v1613_v9, 0.2  ;;  %vm497_vm3 = vcmp.ge.f32.partialorder %v1613_v9, 0.6 }
  0x78   : > { %v1159_v39 = vsel %vm491_vm1, 1.0, %v1346_v17  ;;  %v1160_v40 = vsel %vm494_vm2, 1.0, %v1346_v17  ;;  %v1161_v43 = vsel %vm497_vm3, 1.0, %v1346_v17  ;;  %vm500_vm4 = vcmp.ge.f32.partialorder %v1613_v9, 1.0 }
  0x79   : > { %v1162_v44 = vsel %vm500_vm4, 1.0, %v1346_v17  ;;  %vm503_vm5 = vcmp.ge.f32.partialorder %v1613_v9, 1.4  ;;  %vm506_vm6 = vcmp.ge.f32.partialorder %v1613_v9, 1.8  ;;  %v512_v45 = vsub.f32 %v1154_v30, %v1155_v32 }
  0x7a   : > { %v1271_v46 = vpop.eup %1270  ;;  %v1163_v6 = vsel %vm503_vm5, 1.0, %v1346_v17  ;;  %v1164_v47 = vsel %vm506_vm6, 1.0, %v1346_v17  ;;  %vm509_vm7 = vcmp.ge.f32.partialorder %v1613_v9, 2.2  ;;  %v513_v48 = vsub.f32 %v1155_v32, %v1156_v36 }
  0x7b   : > { %v1703_v7 = vadd.f32 -1.8, %v1613_v9  ;;  %v1706_v49 = vadd.f32 -2.2, %v1613_v9  ;;  %v514_v50 = vsub.f32 %v1156_v36, %v1157_v33  ;;  %v515_v51 = vsub.f32 %v1157_v33, %v1158_v37 }
  0x7c   : > { %v458_v8 = vadd.f32 1.0, %v1271_v46  ;;  %v1165_v52 = vsel %vm509_vm7, 1.0, %v1346_v17  ;;  %v516_v53 = vsub.f32 %v1158_v37, %v1159_v39  ;;  %v517_v10 = vsub.f32 %v1159_v39, %v1160_v40 }
  0x7d   : > { %v518_v54 = vsub.f32 %v1160_v40, %v1161_v43  ;;  %v519_v55 = vsub.f32 %v1161_v43, %v1162_v44  ;;  %v520_v11 = vsub.f32 %v1162_v44, %v1163_v6  ;;  %v521_v12 = vsub.f32 %v1163_v6, %v1164_v47 }
  0x7e   : > { %v523_v57 = vmul.f32 %v1646_v2, %v512_v45  ;;  %v524_v16 = vmul.f32 %v1655_v35, %v513_v48  ;;  %v526_v58 = vmul.f32 %v1652_v3, %v513_v48  ;;  %v527_v13 = vmul.f32 %v1632_v63, %v514_v50 }
  0x7f   : > { %v529_v22 = vmul.f32 %v1655_v35, %v514_v50  ;;  %v530_v60 = vmul.f32 %v1658_v38, %v515_v51  ;;  %v532_v61 = vmul.f32 %v1632_v63, %v515_v51  ;;  %v533_v62 = vmul.f32 %v1663_v4, %v516_v53 }
  0x80   : > { %v522_v15 = vsub.f32 %v1164_v47, %v1165_v52  ;;  %v525_v23 = vsub.f32 %v523_v57, %v524_v16  ;;  %v535_v25 = vmul.f32 %v1658_v38, %v516_v53  ;;  %v536_v27 = vmul.f32 %v1666_v59, %v517_v10 }
  0x81   : > { %v528_v30 = vsub.f32 %v526_v58, %v527_v13  ;;  %v531_v32 = vsub.f32 %v529_v22, %v530_v60  ;;  %v538_v33 = vmul.f32 %v1663_v4, %v517_v10  ;;  %v539_v36 = vmul.f32 %v1672_v21, %v518_v54 }
  0x82   : > { %v534_v37 = vsub.f32 %v532_v61, %v533_v62  ;;  %v541_v39 = vmul.f32 %v1666_v59, %v518_v54  ;;  %v542_v40 = vmul.f32 %v1677_v24, %v519_v55  ;;  %v544_v43 = vmul.f32 %v1672_v21, %v519_v55 }
  0x83   : > { %v537_v44 = vsub.f32 %v535_v25, %v536_v27  ;;  %v545_v45 = vmul.f32 %v1680_v26, %v520_v11  ;;  %v547_v46 = vmul.f32 %v1677_v24, %v520_v11  ;;  %v548_v6 = vmul.f32 %v1703_v7, %v521_v12 }
  0x84   : > { %v540_v47 = vsub.f32 %v538_v33, %v539_v36  ;;  %v550_v48 = vmul.f32 %v1680_v26, %v521_v12  ;;  %v551_v50 = vmul.f32 %v1706_v49, %v522_v15  ;;  %v553_v51 = vmul.f32 %v1646_v2, %v525_v23 }
  0x85   : > { %v543_v52 = vsub.f32 %v541_v39, %v542_v40  ;;  %v546_v53 = vsub.f32 %v544_v43, %v545_v45  ;;  %v554_v10 = vmul.f32 %v1632_v63, %v528_v30  ;;  %v556_v54 = vmul.f32 %v1652_v3, %v528_v30 }
  0x86   : > { %v549_v55 = vsub.f32 %v547_v46, %v548_v6  ;;  %v557_v57 = vmul.f32 %v1658_v38, %v531_v32  ;;  %v559_v11 = vmul.f32 %v1655_v35, %v531_v32  ;;  %v560_v16 = vmul.f32 %v1663_v4, %v534_v37 }
  0x87   : > { %v552_v58 = vsub.f32 %v550_v48, %v551_v50  ;;  %v562_v12 = vmul.f32 %v1632_v63, %v534_v37  ;;  %v563_v13 = vmul.f32 %v1666_v59, %v537_v44  ;;  %v565_v22 = vmul.f32 %v1658_v38, %v537_v44 }
  0x88   : > { %1272 = vrcp.f32 %v458_v8  ;;  %v555_v60 = vsub.f32 %v553_v51, %v554_v10  ;;  %v558_v61 = vsub.f32 %v556_v54, %v557_v57  ;;  %v566_v62 = vmul.f32 %v1672_v21, %v540_v47 }
  0x89   : > { %v561_v15 = vsub.f32 %v559_v11, %v560_v16  ;;  %v568_v23 = vmul.f32 %v1663_v4, %v540_v47  ;;  %v569_v25 = vmul.f32 %v1677_v24, %v543_v52  ;;  %v571_v27 = vmul.f32 %v1666_v59, %v543_v52 }
  0x8a   : > { %v564_v30 = vsub.f32 %v562_v12, %v563_v13  ;;  %v567_v32 = vsub.f32 %v565_v22, %v566_v62  ;;  %v572_v33 = vmul.f32 %v1680_v26, %v546_v53  ;;  %v574_v36 = vmul.f32 %v1672_v21, %v546_v53  ;;  %v1776_v22 = vld [vmem:[%s1439_s20 + $0x10] sm:$0xff] }
  0x8b   : > { %v570_v37 = vsub.f32 %v568_v23, %v569_v25  ;;  %v575_v8 = vmul.f32 %v1703_v7, %v549_v55  ;;  %v577_v39 = vmul.f32 %v1677_v24, %v549_v55  ;;  %v578_v40 = vmul.f32 %v1706_v49, %v552_v58 }
  0x8c   : > { %v573_v43 = vsub.f32 %v571_v27, %v572_v33  ;;  %v580_v44 = vmul.f32 %v1646_v2, %v555_v60  ;;  %v581_v45 = vmul.f32 %v1658_v38, %v558_v61  ;;  %v583_v46 = vmul.f32 %v1652_v3, %v558_v61 }
  0x8d   : > { %v576_v6 = vsub.f32 %v574_v36, %v575_v8  ;;  %v579_v47 = vsub.f32 %v577_v39, %v578_v40  ;;  %v584_v48 = vmul.f32 %v1663_v4, %v561_v15  ;;  %v586_v50 = vmul.f32 %v1655_v35, %v561_v15 }
  0x8e   : > { %v582_v51 = vsub.f32 %v580_v44, %v581_v45  ;;  %v587_v52 = vmul.f32 %v1666_v59, %v564_v30  ;;  %v589_v53 = vmul.f32 %v1632_v63, %v564_v30  ;;  %v590_v10 = vmul.f32 %v1672_v21, %v567_v32 }
  0x8f   : > { %v585_v54 = vsub.f32 %v583_v46, %v584_v48  ;;  %v592_v2 = vmul.f32 %v1658_v38, %v567_v32  ;;  %v593_v3 = vmul.f32 %v1677_v24, %v570_v37  ;;  %v595_v55 = vmul.f32 %v1663_v4, %v570_v37 }
  0x90   : > { %v588_v57 = vsub.f32 %v586_v50, %v587_v52  ;;  %v591_v35 = vsub.f32 %v589_v53, %v590_v10  ;;  %v596_v11 = vmul.f32 %v1680_v26, %v573_v43  ;;  %v598_v63 = vmul.f32 %v1666_v59, %v573_v43 }
  0x91   : > { %v594_v16 = vsub.f32 %v592_v2, %v593_v3  ;;  %v599_v58 = vmul.f32 %v1703_v7, %v576_v6  ;;  %v601_v38 = vmul.f32 %v1672_v21, %v576_v6  ;;  %v602_v24 = vmul.f32 %v1706_v49, %v579_v47 }
  0x92   : > { %v1273_v12 = vpop.eup %1272  ;;  %v597_v4 = vsub.f32 %v595_v55, %v596_v11  ;;  %v605_v13 = vmul.f32 %v604_v41, %v582_v51  ;;  %v607_v26 = vmul.f32 %v606_v42, %v585_v54  ;;  %v610_v59 = vmul.f32 %v609_v56, %v588_v57 }
  0x93   : > { %v600_v7 = vsub.f32 %v598_v63, %v599_v58  ;;  %v603_v60 = vsub.f32 %v601_v38, %v602_v24  ;;  %v612_v21 = vmul.f32 %v611_v0, %v591_v35  ;;  %v616_v61 = vmul.f32 %v615_v1, %v594_v16 }
  0x94   : > { %v608_v49 = vadd.f32 %v607_v26, %v605_v13  ;;  %v618_v62 = vmul.f32 %v617_v31, %v597_v4  ;;  %v620_v15 = vstv %s1747_s10  ;;  %v622_v23 = vstv %s1749_s11 }
  0x95   : > { %v613_v25 = vadd.f32 %v612_v21, %v610_v59  ;;  %v621_v41 = vmul.f32 %v620_v15, %v600_v7  ;;  %v623_v27 = vmul.f32 %v622_v23, %v603_v60  ;;  %v1167_v42 = vmul.f32 -1.442695, %v1776_v22 }
  0x96   : > { %v1790_v56 = vmul.f32 %v286_v14, %v1641_v28  ;;  %v1794_v30 = vadd.f32 %v1649_v34, %v1643_v29  ;;  %v1798_v0 = vadd.f32 %v1669_v18, %v1660_v5  ;;  %v619_v1 = vadd.f32 %v618_v62, %v616_v61 }
  0x97   : > { %v624_v31 = vadd.f32 %v623_v27, %v621_v41  ;;  %1274 = vpow2.f32 %v1167_v42  ;;  %v1803_v32 = vadd.f32 2.2, %v1776_v22  ;;  %v1806_v14 = vadd.f32 1.8, %v1776_v22 }
  0x98   : > { %v1809_v28 = vmul.f32 %v1273_v12, %v1613_v9  ;;  %v1812_v29 = vadd.f32 1.4, %v1776_v22  ;;  %v1815_v34 = vadd.f32 1.0, %v1776_v22  ;;  %v1818_v5 = vadd.f32 0.6, %v1776_v22 }
  0x99   : > { %v1820_v18 = vadd.f32 %v613_v25, %v608_v49  ;;  %v1823_v33 = vadd.f32 0.2, %v1776_v22  ;;  %v1826_v36 = vadd.f32 -0.2, %v1776_v22  ;;  %v1829_v9 = vadd.f32 -0.6, %v1776_v22 }
  0x9a   : > { %v1832_v37 = vadd.f32 -1.0, %v1776_v22  ;;  %v1835_v8 = vadd.f32 -1.4, %v1776_v22  ;;  %vm652_vm8 = vcmp.ge.f32.partialorder %v1776_v22, -2.2  ;;  %v780_v39 = vstv %s1767_s17 }
  0x9b   : > { %v1839_v40 = vadd.f32 %v624_v31, %v619_v1  ;;  %v1842_v43 = vadd.f32 -1.8, %v1776_v22  ;;  %vm655_vm9 = vcmp.ge.f32.partialorder %v1776_v22, -1.8  ;;  %vm658_vm10 = vcmp.ge.f32.partialorder %v1776_v22, -1.4 }
  0x9c   : > { %v1847_v44 = vadd.f32 -2.2, %v1776_v22  ;;  %v1180_v45 = vsel %vm652_vm8, 1.0, %v1346_v17  ;;  %vm661_vm11 = vcmp.ge.f32.partialorder %v1776_v22, -1.0  ;;  %vm664_vm12 = vcmp.ge.f32.partialorder %v1776_v22, -0.6 }
  0x9d   : > { %v1181_v46 = vsel %vm655_vm9, 1.0, %v1346_v17  ;;  %v1182_v6 = vsel %vm658_vm10, 1.0, %v1346_v17  ;;  %v1183_v47 = vsel %vm661_vm11, 1.0, %v1346_v17  ;;  %vm667_vm13 = vcmp.ge.f32.partialorder %v1776_v22, -0.2 }
  0x9e   : > { %v1184_v48 = vsel %vm664_vm12, 1.0, %v1346_v17  ;;  %vm670_vm14 = vcmp.ge.f32.partialorder %v1776_v22, 0.2  ;;  %vm673_vm15 = vcmp.ge.f32.partialorder %v1776_v22, 0.6  ;;  %vm676_vm0 = vcmp.ge.f32.partialorder %v1776_v22, 1.0 }
  0x9f   : > { %v1185_v50 = vsel %vm667_vm13, 1.0, %v1346_v17  ;;  %v1186_v51 = vsel %vm670_vm14, 1.0, %v1346_v17  ;;  %v1187_v52 = vsel %vm673_vm15, 1.0, %v1346_v17  ;;  %vm679_vm1 = vcmp.ge.f32.partialorder %v1776_v22, 1.4 }
  0xa0   : > { %v1188_v53 = vsel %vm676_vm0, 1.0, %v1346_v17  ;;  %vm682_vm2 = vcmp.ge.f32.partialorder %v1776_v22, 1.8  ;;  %vm685_vm3 = vcmp.ge.f32.partialorder %v1776_v22, 2.2  ;;  %v688_v10 = vsub.f32 %v1180_v45, %v1181_v46 }
  0xa1   : > { %v1275_v54 = vpop.eup %1274  ;;  %v1189_v2 = vsel %vm679_vm1, 1.0, %v1346_v17  ;;  %v1190_v3 = vsel %vm682_vm2, 1.0, %v1346_v17  ;;  %v689_v55 = vsub.f32 %v1181_v46, %v1182_v6  ;;  %v690_v57 = vsub.f32 %v1182_v6, %v1183_v47 }
  0xa2   : > { %v1191_v35 = vsel %vm685_vm3, 1.0, %v1346_v17  ;;  %v691_v11 = vsub.f32 %v1183_v47, %v1184_v48  ;;  %v692_v63 = vsub.f32 %v1184_v48, %v1185_v50  ;;  %v782_v16 = vstv %s1800_s14 }
  0xa3   : > { %v634_v58 = vadd.f32 1.0, %v1275_v54  ;;  %v693_v38 = vsub.f32 %v1185_v50, %v1186_v51  ;;  %v694_v24 = vsub.f32 %v1186_v51, %v1187_v52  ;;  %v695_v12 = vsub.f32 %v1187_v52, %v1188_v53 }
  0xa4   : > { %v696_v4 = vsub.f32 %v1188_v53, %v1189_v2  ;;  %v697_v13 = vsub.f32 %v1189_v2, %v1190_v3  ;;  %v699_v26 = vmul.f32 %v1803_v32, %v688_v10  ;;  %v700_v59 = vmul.f32 %v1812_v29, %v689_v55 }
  0xa5   : > { %v702_v7 = vmul.f32 %v1806_v14, %v689_v55  ;;  %v703_v60 = vmul.f32 %v1815_v34, %v690_v57  ;;  %v705_v21 = vmul.f32 %v1812_v29, %v690_v57  ;;  %v706_v61 = vmul.f32 %v1818_v5, %v691_v11 }
  0xa6   : > { %v698_v49 = vsub.f32 %v1190_v3, %v1191_v35  ;;  %v708_v62 = vmul.f32 %v1815_v34, %v691_v11  ;;  %v709_v15 = vmul.f32 %v1823_v33, %v692_v63  ;;  %v711_v23 = vmul.f32 %v1818_v5, %v692_v63 }
  0xa7   : > { %v701_v25 = vsub.f32 %v699_v26, %v700_v59  ;;  %v704_v41 = vsub.f32 %v702_v7, %v703_v60  ;;  %v712_v27 = vmul.f32 %v1826_v36, %v693_v38  ;;  %v714_v42 = vmul.f32 %v1823_v33, %v693_v38 }
  0xa8   : > { %v707_v1 = vsub.f32 %v705_v21, %v706_v61  ;;  %v715_v31 = vmul.f32 %v1829_v9, %v694_v24  ;;  %v717_v45 = vmul.f32 %v1826_v36, %v694_v24  ;;  %v718_v46 = vmul.f32 %v1832_v37, %v695_v12 }
  0xa9   : > { %v710_v6 = vsub.f32 %v708_v62, %v709_v15  ;;  %v720_v47 = vmul.f32 %v1829_v9, %v695_v12  ;;  %v721_v48 = vmul.f32 %v1835_v8, %v696_v4  ;;  %v723_v50 = vmul.f32 %v1832_v37, %v696_v4 }
  0xaa   : > { %v713_v51 = vsub.f32 %v711_v23, %v712_v27  ;;  %v716_v52 = vsub.f32 %v714_v42, %v715_v31  ;;  %v724_v53 = vmul.f32 %v1842_v43, %v697_v13  ;;  %v726_v10 = vmul.f32 %v1835_v8, %v697_v13 }
  0xab   : > { %v719_v54 = vsub.f32 %v717_v45, %v718_v46  ;;  %v727_v2 = vmul.f32 %v1847_v44, %v698_v49  ;;  %v729_v3 = vmul.f32 %v1803_v32, %v701_v25  ;;  %v730_v55 = vmul.f32 %v1815_v34, %v704_v41 }
  0xac   : > { %v722_v57 = vsub.f32 %v720_v47, %v721_v48  ;;  %v732_v35 = vmul.f32 %v1806_v14, %v704_v41  ;;  %v733_v11 = vmul.f32 %v1818_v5, %v707_v1  ;;  %v735_v63 = vmul.f32 %v1812_v29, %v707_v1 }
  0xad   : > { %v725_v38 = vsub.f32 %v723_v50, %v724_v53  ;;  %v728_v24 = vsub.f32 %v726_v10, %v727_v2  ;;  %v736_v12 = vmul.f32 %v1823_v33, %v710_v6  ;;  %v738_v4 = vmul.f32 %v1815_v34, %v710_v6 }
  0xae   : > { %v731_v13 = vsub.f32 %v729_v3, %v730_v55  ;;  %v739_v26 = vmul.f32 %v1826_v36, %v713_v51  ;;  %v741_v59 = vmul.f32 %v1818_v5, %v713_v51  ;;  %v742_v7 = vmul.f32 %v1829_v9, %v716_v52 }
  0xaf   : > { %v734_v60 = vsub.f32 %v732_v35, %v733_v11  ;;  %v737_v21 = vsub.f32 %v735_v63, %v736_v12  ;;  %v744_v61 = vmul.f32 %v1823_v33, %v716_v52  ;;  %v745_v49 = vmul.f32 %v1832_v37, %v719_v54 }
  0xb0   : > { %1276 = vrcp.f32 %v634_v58  ;;  %v740_v62 = vsub.f32 %v738_v4, %v739_v26  ;;  %v747_v15 = vmul.f32 %v1826_v36, %v719_v54  ;;  %v748_v23 = vmul.f32 %v1835_v8, %v722_v57  ;;  %v1947_v26 = vld [vmem:[%s1439_s20 + $0x18] sm:$0xff]  ;;  %s2044_s20 = sld [smem:[#allocation5 + $0x181]] }
  0xb1   : > { %v743_v25 = vsub.f32 %v741_v59, %v742_v7  ;;  %v746_v41 = vsub.f32 %v744_v61, %v745_v49  ;;  %v750_v27 = vmul.f32 %v1829_v9, %v722_v57  ;;  %v751_v42 = vmul.f32 %v1842_v43, %v725_v38 }
  0xb2   : > { %v749_v1 = vsub.f32 %v747_v15, %v748_v23  ;;  %v753_v58 = vmul.f32 %v1832_v37, %v725_v38  ;;  %v754_v31 = vmul.f32 %v1847_v44, %v728_v24  ;;  %v756_v45 = vmul.f32 %v1803_v32, %v731_v13 }
  0xb3   : > { %v752_v46 = vsub.f32 %v750_v27, %v751_v42  ;;  %v757_v6 = vmul.f32 %v1818_v5, %v734_v60  ;;  %v759_v47 = vmul.f32 %v1806_v14, %v734_v60  ;;  %v760_v48 = vmul.f32 %v1823_v33, %v737_v21 }
  0xb4   : > { %v755_v50 = vsub.f32 %v753_v58, %v754_v31  ;;  %v762_v51 = vmul.f32 %v1812_v29, %v737_v21  ;;  %v763_v52 = vmul.f32 %v1826_v36, %v740_v62  ;;  %v765_v32 = vmul.f32 %v1815_v34, %v740_v62 }
  0xb5   : > { %v758_v53 = vsub.f32 %v756_v45, %v757_v6  ;;  %v761_v10 = vsub.f32 %v759_v47, %v760_v48  ;;  %v766_v54 = vmul.f32 %v1829_v9, %v743_v25  ;;  %v768_v2 = vmul.f32 %v1818_v5, %v743_v25 }
  0xb6   : > { %v764_v14 = vsub.f32 %v762_v51, %v763_v52  ;;  %v769_v3 = vmul.f32 %v1832_v37, %v746_v41  ;;  %v771_v55 = vmul.f32 %v1823_v33, %v746_v41  ;;  %v772_v29 = vmul.f32 %v1835_v8, %v749_v1 }
  0xb7   : > { %v767_v57 = vsub.f32 %v765_v32, %v766_v54  ;;  %v774_v34 = vmul.f32 %v1826_v36, %v749_v1  ;;  %v775_v35 = vmul.f32 %v1842_v43, %v752_v46  ;;  %v777_v11 = vmul.f32 %v1829_v9, %v752_v46 }
  0xb8   : > { %v770_v63 = vsub.f32 %v768_v2, %v769_v3  ;;  %v773_v5 = vsub.f32 %v771_v55, %v772_v29  ;;  %v778_v38 = vmul.f32 %v1847_v44, %v755_v50  ;;  %v781_v37 = vmul.f32 %v780_v39, %v758_v53 }
  0xb9   : > { %v776_v33 = vsub.f32 %v774_v34, %v775_v35  ;;  %v783_v8 = vmul.f32 %v782_v16, %v761_v10  ;;  %v785_v36 = vstv %s1905_s18  ;;  %v787_v24 = vstv %s1907_s12 }
  0xba   : > { %v1277_v43 = vpop.eup %1276  ;;  %v779_v12 = vsub.f32 %v777_v11, %v778_v38  ;;  %v786_v9 = vmul.f32 %v785_v36, %v764_v14  ;;  %v788_v4 = vmul.f32 %v787_v24, %v767_v57  ;;  %v791_v13 = vstv %s1911_s23 }
  0xbb   : > { %v784_v44 = vadd.f32 %v783_v8, %v781_v37  ;;  %v792_v59 = vmul.f32 %v791_v13, %v770_v63  ;;  %v793_v7 = vstv %s1916_s24  ;;  %v796_v39 = vstv %s1918_s25 }
  0xbc   : > { %v789_v60 = vadd.f32 %v788_v4, %v786_v9  ;;  %v794_v21 = vmul.f32 %v793_v7, %v773_v5  ;;  %v797_v61 = vmul.f32 %v796_v39, %v776_v33  ;;  %v798_v49 = vstv %s1923_s26 }
  0xbd   : > { %v1954_v16 = vadd.f32 %v1798_v0, %v1794_v30  ;;  %v1959_v62 = vmul.f32 %v462_v19, %v1809_v28  ;;  %v799_v15 = vmul.f32 %v798_v49, %v779_v12  ;;  %v1193_v23 = vmul.f32 -1.442695, %v1947_v26 }
  0xbe   : > { %v1964_v25 = vadd.f32 %v1839_v40, %v1820_v18  ;;  %v1967_v41 = vmul.f32 %v1277_v43, %v1776_v22  ;;  %v795_v27 = vadd.f32 %v794_v21, %v792_v59  ;;  %v1970_v42 = vadd.f32 2.2, %v1947_v26 }
  0xbf   : > { %v800_v30 = vadd.f32 %v799_v15, %v797_v61  ;;  %1278 = vpow2.f32 %v1193_v23  ;;  %v1973_v19 = vadd.f32 1.8, %v1947_v26  ;;  %v1976_v0 = vadd.f32 1.4, %v1947_v26 }
  0xc0   : > { %v1978_v28 = vadd.f32 %v789_v60, %v784_v44  ;;  %v1981_v18 = vadd.f32 1.0, %v1947_v26  ;;  %v1984_v22 = vadd.f32 0.6, %v1947_v26  ;;  %v1987_v40 = vadd.f32 0.2, %v1947_v26 }
  0xc1   : > { %v1990_v1 = vadd.f32 -0.2, %v1947_v26  ;;  %v1993_v58 = vadd.f32 -0.6, %v1947_v26  ;;  %v1996_v31 = vadd.f32 -1.4, %v1947_v26  ;;  %v956_v45 = vstv %s1939_s27 }
  0xc2   : > { %v1999_v46 = vadd.f32 %v800_v30, %v795_v27  ;;  %v2002_v6 = vadd.f32 -1.8, %v1947_v26  ;;  %vm828_vm4 = vcmp.ge.f32.partialorder %v1947_v26, -2.2  ;;  %vm831_vm5 = vcmp.ge.f32.partialorder %v1947_v26, -1.8 }
  0xc3   : > { %v2007_v47 = vadd.f32 -2.2, %v1947_v26  ;;  %v1206_v48 = vsel %vm828_vm4, 1.0, %v1346_v17  ;;  %v1207_v50 = vsel %vm831_vm5, 1.0, %v1346_v17  ;;  %vm834_vm6 = vcmp.ge.f32.partialorder %v1947_v26, -1.4 }
  0xc4   : > { %v2013_v51 = vadd.f32 -1.0, %v1947_v26  ;;  %vm837_vm7 = vcmp.ge.f32.partialorder %v1947_v26, -1.0  ;;  %vm840_vm8 = vcmp.ge.f32.partialorder %v1947_v26, -0.6  ;;  %vm843_vm9 = vcmp.ge.f32.partialorder %v1947_v26, -0.2 }
  0xc5   : > { %v1208_v52 = vsel %vm834_vm6, 1.0, %v1346_v17  ;;  %v1209_v32 = vsel %vm837_vm7, 1.0, %v1346_v17  ;;  %v1210_v53 = vsel %vm840_vm8, 1.0, %v1346_v17  ;;  %v1211_v10 = vsel %vm843_vm9, 1.0, %v1346_v17 }
  0xc6   : > { %vm846_vm10 = vcmp.ge.f32.partialorder %v1947_v26, 0.2  ;;  %vm849_vm11 = vcmp.ge.f32.partialorder %v1947_v26, 0.6  ;;  %vm852_vm12 = vcmp.ge.f32.partialorder %v1947_v26, 1.0  ;;  %v864_v54 = vsub.f32 %v1206_v48, %v1207_v50 }
  0xc7   : > { %v1212_v2 = vsel %vm846_vm10, 1.0, %v1346_v17  ;;  %v1213_v14 = vsel %vm849_vm11, 1.0, %v1346_v17  ;;  %v1214_v3 = vsel %vm852_vm12, 1.0, %v1346_v17  ;;  %vm855_vm13 = vcmp.ge.f32.partialorder %v1947_v26, 1.4 }
  0xc8   : > { %v1215_v55 = vsel %vm855_vm13, 1.0, %v1346_v17  ;;  %vm858_vm14 = vcmp.ge.f32.partialorder %v1947_v26, 1.8  ;;  %vm861_vm15 = vcmp.ge.f32.partialorder %v1947_v26, 2.2  ;;  %v865_v29 = vsub.f32 %v1207_v50, %v1208_v52 }
  0xc9   : > { %v1279_v57 = vpop.eup %1278  ;;  %v1216_v34 = vsel %vm858_vm14, 1.0, %v1346_v17  ;;  %v1217_v35 = vsel %vm861_vm15, 1.0, %v1346_v17  ;;  %v866_v11 = vsub.f32 %v1208_v52, %v1209_v32  ;;  %v867_v63 = vsub.f32 %v1209_v32, %v1210_v53 }
  0xca   : > { %v810_v5 = vadd.f32 1.0, %v1279_v57  ;;  %v868_v38 = vsub.f32 %v1210_v53, %v1211_v10  ;;  %v869_v37 = vsub.f32 %v1211_v10, %v1212_v2  ;;  %v870_v33 = vsub.f32 %v1212_v2, %v1213_v14 }
  0xcb   : > { %v871_v8 = vsub.f32 %v1213_v14, %v1214_v3  ;;  %v872_v36 = vsub.f32 %v1214_v3, %v1215_v55  ;;  %v873_v24 = vsub.f32 %v1215_v55, %v1216_v34  ;;  %v874_v43 = vsub.f32 %v1216_v34, %v1217_v35 }
  0xcc   : > { %1280 = vrcp.f32 %v810_v5  ;;  %v875_v12 = vmul.f32 %v1970_v42, %v864_v54  ;;  %v876_v9 = vmul.f32 %v1976_v0, %v865_v29  ;;  %v878_v4 = vmul.f32 %v1973_v19, %v865_v29 }
  0xcd   : > { %v879_v13 = vmul.f32 %v1981_v18, %v866_v11  ;;  %v881_v17 = vmul.f32 %v1976_v0, %v866_v11  ;;  %v882_v44 = vmul.f32 %v1984_v22, %v867_v63  ;;  %v884_v59 = vmul.f32 %v1981_v18, %v867_v63 }
  0xce   : > { %v877_v7 = vsub.f32 %v875_v12, %v876_v9  ;;  %v885_v39 = vmul.f32 %v1987_v40, %v868_v38  ;;  %v887_v60 = vmul.f32 %v1984_v22, %v868_v38  ;;  %v888_v21 = vmul.f32 %v1990_v1, %v869_v37 }
  0xcf   : > { %v880_v61 = vsub.f32 %v878_v4, %v879_v13  ;;  %v883_v49 = vsub.f32 %v881_v17, %v882_v44  ;;  %v890_v15 = vmul.f32 %v1987_v40, %v869_v37  ;;  %v891_v23 = vmul.f32 %v1993_v58, %v870_v33 }
  0xd0   : > { %v886_v27 = vsub.f32 %v884_v59, %v885_v39  ;;  %v889_v30 = vsub.f32 %v887_v60, %v888_v21  ;;  %v893_v48 = vmul.f32 %v1990_v1, %v870_v33  ;;  %v894_v50 = vmul.f32 %v2013_v51, %v871_v8 }
  0xd1   : > { %v892_v52 = vsub.f32 %v890_v15, %v891_v23  ;;  %v896_v32 = vmul.f32 %v1993_v58, %v871_v8  ;;  %v897_v53 = vmul.f32 %v1996_v31, %v872_v36  ;;  %v899_v10 = vmul.f32 %v2013_v51, %v872_v36 }
  0xd2   : > { %v895_v54 = vsub.f32 %v893_v48, %v894_v50  ;;  %v900_v2 = vmul.f32 %v2002_v6, %v873_v24  ;;  %v902_v14 = vmul.f32 %v1996_v31, %v873_v24  ;;  %v903_v3 = vmul.f32 %v2007_v47, %v874_v43 }
  0xd3   : > { %v898_v55 = vsub.f32 %v896_v32, %v897_v53  ;;  %v905_v29 = vmul.f32 %v1970_v42, %v877_v7  ;;  %v906_v57 = vmul.f32 %v1981_v18, %v880_v61  ;;  %v908_v34 = vmul.f32 %v1973_v19, %v880_v61 }
  0xd4   : > { %v901_v35 = vsub.f32 %v899_v10, %v900_v2  ;;  %v904_v11 = vsub.f32 %v902_v14, %v903_v3  ;;  %v909_v63 = vmul.f32 %v1984_v22, %v883_v49  ;;  %v911_v5 = vmul.f32 %v1976_v0, %v883_v49 }
  0xd5   : > { %v907_v38 = vsub.f32 %v905_v29, %v906_v57  ;;  %v912_v37 = vmul.f32 %v1987_v40, %v886_v27  ;;  %v914_v33 = vmul.f32 %v1981_v18, %v886_v27  ;;  %v915_v8 = vmul.f32 %v1990_v1, %v889_v30 }
  0xd6   : > { %v1281_v36 = vpop.eup %1280  ;;  %v910_v24 = vsub.f32 %v908_v34, %v909_v63  ;;  %v917_v43 = vmul.f32 %v1984_v22, %v889_v30  ;;  %v918_v12 = vmul.f32 %v1993_v58, %v892_v52  ;;  %v920_v9 = vmul.f32 %v1987_v40, %v892_v52 }
  0xd7   : > { %v2068_v4 = vmul.f32 %v1281_v36, %v1947_v26  ;;  %v913_v13 = vsub.f32 %v911_v5, %v912_v37  ;;  %v921_v17 = vmul.f32 %v2013_v51, %v895_v54  ;;  %v958_v44 = vstv %s2044_s20 }
  0xd8   : > { %v916_v59 = vsub.f32 %v914_v33, %v915_v8  ;;  %v923_v7 = vmul.f32 %v1990_v1, %v895_v54  ;;  %v924_v39 = vmul.f32 %v1996_v31, %v898_v55  ;;  %v926_v60 = vmul.f32 %v1993_v58, %v898_v55 }
  0xd9   : > { %v919_v21 = vsub.f32 %v917_v43, %v918_v12  ;;  %v922_v26 = vsub.f32 %v920_v9, %v921_v17  ;;  %v927_v61 = vmul.f32 %v2002_v6, %v901_v35  ;;  %v929_v49 = vmul.f32 %v2013_v51, %v901_v35 }
  0xda   : > { %v925_v15 = vsub.f32 %v923_v7, %v924_v39  ;;  %v930_v23 = vmul.f32 %v2007_v47, %v904_v11  ;;  %v932_v27 = vmul.f32 %v1970_v42, %v907_v38  ;;  %v933_v30 = vmul.f32 %v1984_v22, %v910_v24 }
  0xdb   : > { %v928_v48 = vsub.f32 %v926_v60, %v927_v61  ;;  %v935_v50 = vmul.f32 %v1973_v19, %v910_v24  ;;  %v936_v52 = vmul.f32 %v1987_v40, %v913_v13  ;;  %v938_v32 = vmul.f32 %v1976_v0, %v913_v13 }
  0xdc   : > { %v931_v53 = vsub.f32 %v929_v49, %v930_v23  ;;  %v934_v10 = vsub.f32 %v932_v27, %v933_v30  ;;  %v939_v54 = vmul.f32 %v1990_v1, %v916_v59  ;;  %v941_v2 = vmul.f32 %v1981_v18, %v916_v59 }
  0xdd   : > { %v937_v42 = vsub.f32 %v935_v50, %v936_v52  ;;  %v942_v14 = vmul.f32 %v1993_v58, %v919_v21  ;;  %v944_v3 = vmul.f32 %v1984_v22, %v919_v21  ;;  %v945_v19 = vmul.f32 %v2013_v51, %v922_v26 }
  0xde   : > { %v940_v0 = vsub.f32 %v938_v32, %v939_v54  ;;  %v947_v55 = vmul.f32 %v1987_v40, %v922_v26  ;;  %v948_v29 = vmul.f32 %v1996_v31, %v925_v15  ;;  %v950_v18 = vmul.f32 %v1990_v1, %v925_v15 }
  0xdf   : > { %v943_v57 = vsub.f32 %v941_v2, %v942_v14  ;;  %v946_v34 = vsub.f32 %v944_v3, %v945_v19  ;;  %v951_v35 = vmul.f32 %v2002_v6, %v928_v48  ;;  %v953_v11 = vmul.f32 %v1993_v58, %v928_v48 }
  0xe0   : > { %v949_v22 = vsub.f32 %v947_v55, %v948_v29  ;;  %v954_v51 = vmul.f32 %v2007_v47, %v931_v53  ;;  %v957_v63 = vmul.f32 %v956_v45, %v934_v10  ;;  %v959_v40 = vmul.f32 %v958_v44, %v937_v42 }
  0xe1   : > { %v952_v5 = vsub.f32 %v950_v18, %v951_v35  ;;  %v961_v31 = vstv %s2072_s21  ;;  %v963_v1 = vstv %s2077_s28  ;;  %v967_v38 = vstv %s2079_s29 }
  0xe2   : > { %v955_v37 = vsub.f32 %v953_v11, %v954_v51  ;;  %v960_v33 = vadd.f32 %v959_v40, %v957_v63  ;;  %v962_v6 = vmul.f32 %v961_v31, %v940_v0  ;;  %v964_v8 = vmul.f32 %v963_v1, %v943_v57 }
  0xe3   : > { %v968_v58 = vmul.f32 %v967_v38, %v946_v34  ;;  %v969_v36 = vstv %s2083_s30  ;;  %v972_v24 = vstv %s2088_s4  ;;  %v974_v43 = vstv %s2090_s5 }
  0xe4   : > { %v965_v47 = vadd.f32 %v964_v8, %v962_v6  ;;  %v970_v12 = vmul.f32 %v969_v36, %v949_v22  ;;  %v973_v45 = vmul.f32 %v972_v24, %v952_v5  ;;  %v975_v9 = vmul.f32 %v974_v43, %v955_v37 }
  0xe5   : > { %v639_v13 = vmul.f32 %v638_v20, %v1967_v41  ;;  %v814_v17 = vstv %s2097_s6  ;;  %v802_v44 = vadd.f32 %v1999_v46, %v1978_v28  ;;  %v451_v60 = vadd.f32 %v1954_v16, %v1790_v56 }
  0xe6   : > { %v966_v59 = vadd.f32 %v965_v47, %v960_v33  ;;  %v971_v7 = vadd.f32 %v970_v12, %v968_v58  ;;  %v976_v39 = vadd.f32 %v975_v9, %v973_v45  ;;  %v627_v21 = vadd.f32 %v1964_v25, %v1959_v62 }
  0xe7   : > { %v815_v26 = vmul.f32 %v814_v17, %v2068_v4  ;;  %v803_v49 = vadd.f32 %v802_v44, %v639_v13 }
  0xe8   : > { %v977_v61 = vadd.f32 %v976_v39, %v971_v7  ;;  %v980_v41 = vadd.f32 %v627_v21, %v451_v60 }
  0xea   : > { %v978_v15 = vadd.f32 %v977_v61, %v966_v59 }
  0xec   : > { %v979_v20 = vadd.f32 %v978_v15, %v815_v26 }
  0xee   : > { %v981_v23 = vadd.f32 %v979_v20, %v803_v49 }
  0xf0   : > { %v982_v28 = vadd.f32 %v981_v23, %v980_v41 }
  0xf2   : > { %983 = vst [vmem:[%s241_s9] sm:$0xff] %v982_v28 }
  0xf3 PF: > { %p12_p2 = scmp.ge.s32.totalorder %s1386_s16, 4   ;;  %s2157_s12 = smov %s1338_s13 }
  0xf4   : > { %s2158_s13 = smov %s1396_s19  ;;  %s2159_s14 = smov %s1386_s16 }
  0xf5   :  { %14 = sbr.rel (!%p12_p2) target bundleno = 3 (0x3), region = 117 }
  0xfc   :  { %1003 = vsyncpa [#allocation4], 1 }
  0xfd   :  { %1005 = vsyncpa [#allocation4 + $0x1], 1 }
  0xfe   :  { %1006 = vsyncpa [#allocation6], 1 }

</bundles_post_ra>
